<compile_context>
chip_gen: v5e
topology: v5e:2x2
jax: 0.10.0
libtpu: 0.0.40
codegen_flags: <defaults>
</compile_context>

<pallas_src>
import jax
import jax.numpy as jnp
from jax import lax
from jax.experimental import pallas as pl
from jax.experimental.pallas import tpu as pltpu


# ---------------------------------------------------------------------------
# Generation-dependent defaults
# ---------------------------------------------------------------------------
def _tpu_generation():
    try:
        kind = jax.devices()[0].device_kind.lower()
    except Exception:
        return None
    for tag in ("v7", "v6", "v5"):
        if tag in kind:
            return tag
    return None


def _default_vmem_limit(gen):
    if gen == "v7":
        return 48 * 1024 * 1024     # 64 MiB physical per TC -> stay below
    if gen in ("v5", "v6"):
        return 96 * 1024 * 1024     # 128 MiB physical
    return 48 * 1024 * 1024         # unknown: conservative


def _pick_block(dim, candidates):
    """Largest candidate that divides dim, else the full extent (always legal)."""
    for c in candidates:
        if c <= dim and dim % c == 0:
            return c
    return dim


def _pick_block_pad(dim, candidates, pad_block):
    """Largest candidate dividing dim; if none, return pad_block (caller pads dim)."""
    for c in candidates:
        if c <= dim and dim % c == 0:
            return c
    return pad_block


# ---------------------------------------------------------------------------
# Tiled matmul kernels:  O = X @ W (+ b), f32 accumulation
# ---------------------------------------------------------------------------
def _matmul_kernel(x_ref, w_ref, o_ref, acc_ref):
    k = pl.program_id(2)

    @pl.when(k == 0)
    def _():
        acc_ref[...] = jnp.zeros_like(acc_ref)

    acc_ref[...] += jnp.dot(x_ref[...], w_ref[...],
                            preferred_element_type=jnp.float32)

    @pl.when(k == pl.num_programs(2) - 1)
    def _():
        o_ref[...] = acc_ref[...].astype(o_ref.dtype)


def _matmul_bias_kernel(x_ref, w_ref, b_ref, o_ref, acc_ref):
    k = pl.program_id(2)

    @pl.when(k == 0)
    def _():
        acc_ref[...] = jnp.zeros_like(acc_ref)

    acc_ref[...] += jnp.dot(x_ref[...], w_ref[...],
                            preferred_element_type=jnp.float32)

    @pl.when(k == pl.num_programs(2) - 1)
    def _():
        o_ref[...] = (acc_ref[...] + b_ref[...]).astype(o_ref.dtype)


def _matmul(x2d, w, bias=None, *, out_dtype, bm, bn, bk, vmem_limit):
    """x2d: (M, K); w: (K, Nf); bias: (1, Nf) f32 or None.  Pads M up to bm."""
    M, K = x2d.shape
    Kw, Nf = w.shape
    assert K == Kw
    assert Nf % bn == 0 and K % bk == 0, "block_n/block_k must divide the dims"

    M_pad = -(-M // bm) * bm
    if M_pad != M:
        x2d = jnp.pad(x2d, ((0, M_pad - M), (0, 0)))

    if bias is None:
        kernel = _matmul_kernel
        in_specs = [
            pl.BlockSpec((bm, bk), lambda i, j, k: (i, k)),   # X tile
            pl.BlockSpec((bk, bn), lambda i, j, k: (k, j)),   # W tile
        ]
        args = (x2d, w)
    else:
        kernel = _matmul_bias_kernel
        in_specs = [
            pl.BlockSpec((bm, bk), lambda i, j, k: (i, k)),   # X tile
            pl.BlockSpec((bk, bn), lambda i, j, k: (k, j)),   # W tile
            pl.BlockSpec((1, bn), lambda i, j, k: (0, j)),    # bias tile (f32)
        ]
        args = (x2d, w, bias)

    out = pl.pallas_call(
        kernel,
        out_shape=jax.ShapeDtypeStruct((M_pad, Nf), out_dtype),
        grid_spec=pltpu.PrefetchScalarGridSpec(
            num_scalar_prefetch=0,
            grid=(M_pad // bm, Nf // bn, K // bk),
            in_specs=in_specs,
            out_specs=pl.BlockSpec((bm, bn), lambda i, j, k: (i, j)),
            scratch_shapes=[pltpu.VMEM((bm, bn), jnp.float32)],
        ),
        compiler_params=pltpu.CompilerParams(
            dimension_semantics=("parallel", "parallel", "arbitrary"),
            vmem_limit_bytes=vmem_limit,
        ),
    )(*args)

    if M_pad != M:
        out = out[:M]
    return out


# ---------------------------------------------------------------------------
# Flash-style attention kernel on the PACKED qkv activation.
# Grid = (B, H, q-tiles, kv-tiles); q/k/v blocks are sliced from (B, N, 3*D),
# the output block is written into the head-merged (B, N, D) layout directly.
# Softmax scale is already folded into q (via the qkv weight), so no scale here.
# ---------------------------------------------------------------------------
def _flash_attn_kernel(q_ref, k_ref, v_ref, o_ref, m_sc, l_sc, acc_sc):
    ki = pl.program_id(3)

    @pl.when(ki == 0)
    def _():
        m_sc[...] = jnp.full_like(m_sc, -jnp.inf)
        l_sc[...] = jnp.zeros_like(l_sc)
        acc_sc[...] = jnp.zeros_like(acc_sc)

    q = q_ref[0]                       # (bq, hd)   compute dtype
    k = k_ref[0]                       # (bkv, hd)
    v = v_ref[0]                       # (bkv, hd)

    # q @ k^T without materializing a transpose: contract last dims of both.
    s = lax.dot_general(q, k, (((1,), (1,)), ((), ())),
                        preferred_element_type=jnp.float32)      # (bq, bkv) f32

    m_prev = m_sc[...]                                           # (bq, 1)
    m_new = jnp.maximum(m_prev, jnp.max(s, axis=-1, keepdims=True))
    alpha = jnp.exp(m_prev - m_new)                              # (bq, 1)
    # Cast p to the value dtype right after the exp (halves spill traffic);
    # the row-sum still accumulates in f32.
    p = jnp.exp(s - m_new).astype(v.dtype)                       # (bq, bkv)

    l_sc[...] = alpha * l_sc[...] + jnp.sum(p, axis=-1, keepdims=True,
                                            dtype=jnp.float32)
    acc_sc[...] = alpha * acc_sc[...] + jnp.dot(
        p, v, preferred_element_type=jnp.float32)
    m_sc[...] = m_new

    @pl.when(ki == pl.num_programs(3) - 1)
    def _():
        inv_l = pl.reciprocal(l_sc[...], approx=True)            # EUP slot
        o_ref[0] = (acc_sc[...] * inv_l).astype(o_ref.dtype)


def _flash_attention_packed(qkv, *, B, N, D, H, hd, out_dtype, bq, bkv, vmem_limit):
    """qkv: (B, N, 3*D) with feature order (3, H, hd).  Returns (B, N, D)."""
    assert N % bq == 0 and N % bkv == 0

    q_map = lambda b, h, qi, ki: (b, qi, h)            # noqa: E731
    k_map = lambda b, h, qi, ki: (b, ki, H + h)        # noqa: E731
    v_map = lambda b, h, qi, ki: (b, ki, 2 * H + h)    # noqa: E731
    o_map = lambda b, h, qi, ki: (b, qi, h)            # noqa: E731

    return pl.pallas_call(
        _flash_attn_kernel,
        out_shape=jax.ShapeDtypeStruct((B, N, D), out_dtype),
        grid_spec=pltpu.PrefetchScalarGridSpec(
            num_scalar_prefetch=0,
            grid=(B, H, N // bq, N // bkv),
            in_specs=[
                pl.BlockSpec((1, bq, hd), q_map),      # q block from packed qkv
                pl.BlockSpec((1, bkv, hd), k_map),     # k block from packed qkv
                pl.BlockSpec((1, bkv, hd), v_map),     # v block from packed qkv
            ],
            out_specs=pl.BlockSpec((1, bq, hd), o_map),  # head-merged layout
            scratch_shapes=[
                pltpu.VMEM((bq, 1), jnp.float32),      # running max
                pltpu.VMEM((bq, 1), jnp.float32),      # running sum
                pltpu.VMEM((bq, hd), jnp.float32),     # output accumulator
            ],
        ),
        compiler_params=pltpu.CompilerParams(
            dimension_semantics=("parallel", "parallel", "parallel", "arbitrary"),
            vmem_limit_bytes=vmem_limit,
        ),
    )(qkv, qkv, qkv)


# ---------------------------------------------------------------------------
# One-time parameter prep (hoisted out of the per-call path)
# ---------------------------------------------------------------------------
def prepare_self_attention_params(qkv_w, qkv_b, proj_w, proj_b, *, num_heads,
                                  qk_scale=None, compute_dtype=jnp.bfloat16):
    """qkv_w: (3D, D) [PyTorch layout]; qkv_b: (3D,) or None; proj_w: (D, D); proj_b: (D,)."""
    threeD, D = qkv_w.shape
    assert threeD == 3 * D
    hd = D // num_heads
    assert hd * num_heads == D, "dim must be divisible by num_heads"
    scale = qk_scale if qk_scale is not None else hd ** (-0.5)

    # Fold the softmax scale into the q columns of the pre-transposed qkv weight.
    col_scale = jnp.concatenate([
        jnp.full((D,), scale, dtype=qkv_w.dtype),
        jnp.ones((2 * D,), dtype=qkv_w.dtype),
    ])
    wqkv_t = (qkv_w.T * col_scale[None, :]).astype(compute_dtype)   # (D, 3D)
    wproj_t = proj_w.T.astype(compute_dtype)                        # (D, D)

    if qkv_b is not None:
        # q portion of the bias must be scaled identically to the q weight columns.
        qkv_b2 = (qkv_b * col_scale).reshape(1, 3 * D).astype(jnp.float32)
    else:
        qkv_b2 = None
    proj_b2 = proj_b.reshape(1, D).astype(jnp.float32)

    return dict(wqkv_t=wqkv_t, qkv_b=qkv_b2, wproj_t=wproj_t, proj_b=proj_b2,
                compute_dtype=compute_dtype, num_heads=num_heads)


# ---------------------------------------------------------------------------
# Wrapper mirroring SelfAttention.forward
# ---------------------------------------------------------------------------
def self_attention(x, params, *, block_q=None, block_kv=None,
                   block_m=None, block_n=None, block_k=None):
    """x: (B, N, D); params from prepare_self_attention_params."""
    B, N, D = x.shape
    H = params["num_heads"]
    hd = D // H
    cdt = params["compute_dtype"]
    out_dtype = x.dtype

    # TODO(synk): head_dim < 128 would need the older transpose-based head split
    # (lane-dim constraint); this packed-qkv fast path requires hd % 128 == 0.
    assert hd % 128 == 0, "packed-qkv attention path requires head_dim % 128 == 0"

    gen = _tpu_generation()
    vmem_limit = _default_vmem_limit(gen)
    bkv_candidates = (128,) if gen == "v5" else (256, 128)

    M = B * N
    bm = block_m or _pick_block_pad(M, (512, 256, 128), 256)
    bk = block_k or _pick_block(D, (512, 256, 128))
    bn_qkv = block_n or _pick_block(3 * D, (512, 256, 128))
    bn_proj = block_n or _pick_block(D, (512, 256, 128))
    bq = block_q or _pick_block(N, (512, 256, 128))
    bkv = block_kv or _pick_block(N, bkv_candidates)

    x2d = x.reshape(M, D).astype(cdt)

    # --- qkv projection (Linear; no bias by default -> no-bias kernel, no zero-bias DMA)
    qkv = _matmul(x2d, params["wqkv_t"], params["qkv_b"], out_dtype=cdt,
                  bm=bm, bn=bn_qkv, bk=bk, vmem_limit=vmem_limit)        # (M, 3D)
    qkv = qkv.reshape(B, N, 3 * D)    # free reshape; feature order is (3, H, hd)

    # --- flash attention reading packed qkv directly; writes head-merged (B, N, D).
    #     dropout_p = 0.0 -> identity.
    ctx = _flash_attention_packed(qkv, B=B, N=N, D=D, H=H, hd=hd,
                                  out_dtype=cdt, bq=bq, bkv=bkv,
                                  vmem_limit=vmem_limit)                 # (B, N, D)

    # --- output projection (Linear with bias); merge-heads already done by layout.
    out = _matmul(ctx.reshape(M, D), params["wproj_t"], params["proj_b"],
                  out_dtype=out_dtype, bm=bm, bn=bn_proj, bk=bk,
                  vmem_limit=vmem_limit)                                 # (M, D)

    return out.reshape(B, N, D)


# ---------------------------------------------------------------------------
# Pure-JAX reference mirroring the PyTorch forward exactly (f32 math)
# ---------------------------------------------------------------------------
def self_attention_ref(x, qkv_w, proj_w, proj_b, *, num_heads):
    B, N, D = x.shape
    hd = D // num_heads
    scale = hd ** (-0.5)
    qkv = jnp.einsum("bnd,ed->bne", x, qkv_w)                        # (B, N, 3D)
    qkv = qkv.reshape(B, N, 3, num_heads, hd).transpose(2, 0, 3, 1, 4)
    q, k, v = qkv[0], qkv[1], qkv[2]                                  # (B, H, N, hd)
    attn = jnp.einsum("bhqd,bhkd->bhqk", q, k) * scale
    attn = jax.nn.softmax(attn, axis=-1)
    ctx = jnp.einsum("bhqk,bhkd->bhqd", attn, v)
    ctx = ctx.transpose(0, 2, 1, 3).reshape(B, N, D)
    return jnp.einsum("bnd,ed->bne", ctx, proj_w) + proj_b


if __name__ == "__main__":
    B, N, D, H = 2, 512, 256, 2      # head_dim = 128 -> lane-dense blocks everywhere

    key = jax.random.PRNGKey(0)
    kx, kq, kp, kb = jax.random.split(key, 4)

    x = jax.random.normal(kx, (B, N, D), dtype=jnp.float32)
    qkv_w = jax.random.normal(kq, (3 * D, D), dtype=jnp.float32) * 0.05  # qkv_bias=False
    proj_w = jax.random.normal(kp, (D, D), dtype=jnp.float32) * 0.05
    proj_b = jax.random.normal(kb, (D,), dtype=jnp.float32) * 0.05

    ref = self_attention_ref(x, qkv_w, proj_w, proj_b, num_heads=H)

    # 1) performance path (default): bf16 matmul operands, f32 MXU accumulation.
    #    Weight prep done ONCE here, not per forward call.
    params_bf16 = prepare_self_attention_params(
        qkv_w, None, proj_w, proj_b, num_heads=H, compute_dtype=jnp.bfloat16)
    out_bf16 = jax.block_until_ready(self_attention(x, params_bf16))
    assert out_bf16.shape == (B, N, D)
    assert jnp.allclose(out_bf16, ref, atol=5e-2, rtol=5e-2), "bf16 mismatch vs reference"

    # 2) debug path: f32 operands, f32 accumulation.
    params_f32 = prepare_self_attention_params(
        qkv_w, None, proj_w, proj_b, num_heads=H, compute_dtype=jnp.float32)
    out_f32 = jax.block_until_ready(self_attention(x, params_f32))
    assert out_f32.shape == (B, N, D)
    assert jnp.allclose(out_f32, ref, atol=2e-2, rtol=2e-2), "f32 mismatch vs reference"

    print("KERNEL_OK")
</pallas_src>

<mosaic_0001>
module attributes {stable_mosaic.version = 11 : i64} {
  func.func @_matmul_kernel(%arg0: i32, %arg1: i32, %arg2: i32, %arg3: memref<512x256xbf16, #tpu.memory_space<vmem>>, %arg4: memref<256x256xbf16, #tpu.memory_space<vmem>>, %arg5: memref<512x256xbf16, #tpu.memory_space<vmem>>, %arg6: memref<512x256xf32, #tpu.memory_space<vmem>>) attributes {dimension_semantics = [#tpu.dimension_semantics<parallel>, #tpu.dimension_semantics<parallel>, #tpu.dimension_semantics<arbitrary>], iteration_bounds = array<i64: 2, 3, 1>, scalar_prefetch = 0 : i64, scratch_operands = 1 : i64, tpu.core_type = #tpu.core_type<tc>, window_params = [{transform_indices = @transform_0, window_bounds = array<i64: 512, 256>}, {transform_indices = @transform_1, window_bounds = array<i64: 256, 256>}, {transform_indices = @transform_2, window_bounds = array<i64: 512, 256>}]} {
    %c0_i32 = arith.constant 0 : i32
    %0 = arith.cmpi eq, %arg2, %c0_i32 : i32
    %1 = arith.extui %0 : i1 to i32
    %c0_i32_0 = arith.constant 0 : i32
    %2 = arith.cmpi ne, %1, %c0_i32_0 : i32
    scf.if %2 {
      %cst_10 = arith.constant 0.000000e+00 : f32
      %12 = vector.broadcast %cst_10 : f32 to vector<512x256xf32>
      %c0_11 = arith.constant 0 : index
      %c0_12 = arith.constant 0 : index
      %13 = vector.load %arg6[%c0_11, %c0_12] : memref<512x256xf32, #tpu.memory_space<vmem>>, vector<512x256xf32>
      tpu.vector_store %arg6[%c0_11, %c0_12], %12 {strides = array<i32>} : memref<512x256xf32, #tpu.memory_space<vmem>>, vector<512x256xf32>,
    } else {
    }
    %c0 = arith.constant 0 : index
    %c0_1 = arith.constant 0 : index
    %3 = vector.load %arg6[%c0, %c0_1] : memref<512x256xf32, #tpu.memory_space<vmem>>, vector<512x256xf32>
    %c0_2 = arith.constant 0 : index
    %c0_3 = arith.constant 0 : index
    %4 = vector.load %arg3[%c0_2, %c0_3] : memref<512x256xbf16, #tpu.memory_space<vmem>>, vector<512x256xbf16>
    %c0_4 = arith.constant 0 : index
    %c0_5 = arith.constant 0 : index
    %5 = vector.load %arg4[%c0_4, %c0_5] : memref<256x256xbf16, #tpu.memory_space<vmem>>, vector<256x256xbf16>
    %cst = arith.constant dense<0.000000e+00> : vector<512x256xf32>
    %6 = tpu.matmul %4, %5, %cst {dimension_numbers = #tpu.dot_dimension_numbers<[1], [0], [0], [1], [0, 0, 1, 1], [], []>} : vector<512x256xbf16>, vector<256x256xbf16>, vector<512x256xf32> -> vector<512x256xf32>
    %7 = arith.addf %3, %6 : vector<512x256xf32>
    %c0_6 = arith.constant 0 : index
    %c0_7 = arith.constant 0 : index
    %8 = vector.load %arg6[%c0_6, %c0_7] : memref<512x256xf32, #tpu.memory_space<vmem>>, vector<512x256xf32>
    tpu.vector_store %arg6[%c0_6, %c0_7], %7 {strides = array<i32>} : memref<512x256xf32, #tpu.memory_space<vmem>>, vector<512x256xf32>,
    %c0_i32_8 = arith.constant 0 : i32
    %9 = arith.cmpi eq, %arg2, %c0_i32_8 : i32
    %10 = arith.extui %9 : i1 to i32
    %c0_i32_9 = arith.constant 0 : i32
    %11 = arith.cmpi ne, %10, %c0_i32_9 : i32
    scf.if %11 {
      %c0_10 = arith.constant 0 : index
      %c0_11 = arith.constant 0 : index
      %12 = vector.load %arg6[%c0_10, %c0_11] : memref<512x256xf32, #tpu.memory_space<vmem>>, vector<512x256xf32>
      %13 = arith.truncf %12 : vector<512x256xf32> to vector<512x256xbf16>
      %c0_12 = arith.constant 0 : index
      %c0_13 = arith.constant 0 : index
      %14 = vector.load %arg5[%c0_12, %c0_13] : memref<512x256xbf16, #tpu.memory_space<vmem>>, vector<512x256xbf16>
      tpu.vector_store %arg5[%c0_12, %c0_13], %13 {strides = array<i32>} : memref<512x256xbf16, #tpu.memory_space<vmem>>, vector<512x256xbf16>,
    } else {
    }
    return
  }
  func.func @transform_0(%arg0: i32, %arg1: i32, %arg2: i32) -> (i32, i32) {
    %c0_i32 = arith.constant 0 : i32
    return %arg0, %arg2 : i32, i32
  }
  func.func @transform_1(%arg0: i32, %arg1: i32, %arg2: i32) -> (i32, i32) {
    %c0_i32 = arith.constant 0 : i32
    return %arg2, %arg1 : i32, i32
  }
  func.func @transform_2(%arg0: i32, %arg1: i32, %arg2: i32) -> (i32, i32) {
    %c0_i32 = arith.constant 0 : i32
    return %arg0, %arg1 : i32, i32
  }
}

</mosaic_0001>

<bundles_post_ra>
// kernel: tpu_custom_call.1
= control target key start
LH: loop header
LB: loop body
LE: loop exit
PB: predicated region body
PF: predicated region fallthrough
CT: control target
= control target key end

     0   :  { %s3806_s0 = inlined_call_operand.hbm [shape: bf16[1024,256], index: 0, kind: input, shape index: {}]   ;;  %s3807_s1 = inlined_call_operand.hbm [shape: bf16[256,768], index: 1, kind: input, shape index: {}]   ;;  %s3808_s2 = inlined_call_operand.hbm [shape: bf16[1024,768], index: 2, kind: output, shape index: {}]  }
   0x1   :  { %3817 = sst [smem:[#allocation18_spill]] %s3806_s0 }
   0x2   :  { %3818 = sst [smem:[#allocation19_spill]] %s3808_s2 }
   0x3   :  { %7 = vsyncpa [#allocation4], 0 }
   0x4   :  { %9 = vsyncpa [#allocation4 + $0x1], 0 }
   0x5   :  { %10 = vsyncpa [#allocation7], 0 }
   0x6   :  { %12 = vsyncpa [#allocation7 + $0x1], 0 }
   0x7   :  { %13 = vsyncpa [#allocation5], 0 }
   0x8   :  { %15 = vsyncpa [#allocation5 + $0x1], 0  ;;  %s3284_s9 = smov 0   ;;  %s3286_s10 = smov 0  }
   0x9   :  { %s3288_s11 = smov 0   ;;  %s3290_s12 = smov 0  }
   0xa   :  { %s3292_s13 = smov 0   ;;  %s3294_s14 = smov 0  }
   0xb   :  { %s3296_s15 = smov 0   ;;  %s3298_s16 = smov 0  }
   0xc   :  { %s3300_s17 = smov 0   ;;  %s3302_s18 = smov 0  }
   0xd   :  { %s3304_s19 = smov 0   ;;  %s3306_s20 = smov 0  }
   0xe   :  { %s3308_s21 = smov 0   ;;  %s3310_s22 = smov 0  }
   0xf LB: > { %3819 = sst [smem:[#allocation12_spill]] %s3245_s18  ;;  %s2408_s23 = sadd.s32 4294967295, %s3261_s22   ;;  %s3261_s22 = sphi %s3310_s22, %s21_s22   ;;  %s3257_s21 = sphi %s3308_s21, %s3843_s21   ;;  %s3253_s20 = sphi %s3306_s20, %s3855_s20   ;;  %s3249_s19 = sphi %s3304_s19, %s3854_s19   ;;  %s3245_s18 = sphi %s3302_s18, %s3853_s18   ;;  %s3241_s17 = sphi %s3300_s17, %s3852_s17   ;;  %s3237_s16 = sphi %s3298_s16, %s3851_s16   ;;  %s3233_s15 = sphi %s3296_s15, %s3850_s15   ;;  %s3229_s14 = sphi %s3294_s14, %s3849_s14   ;;  %s3225_s13 = sphi %s3292_s13, %s3848_s13   ;;  %s3221_s12 = sphi %s3290_s12, %s3847_s12   ;;  %s3217_s11 = sphi %s3288_s11, %s3846_s11   ;;  %s3213_s10 = sphi %s3286_s10, %s3845_s10   ;;  %s3209_s9 = sphi %s3284_s9, %s3844_s9  }
  0x10   : > { %3820 = sst [smem:[#allocation13_spill]] %s3257_s21  ;;  %s40_s24 = sadd.s32 1, %s3257_s21 }
  0x11   : > { %s49_s25 = sadd.s32 1, %s3241_s17  ;;  %p56_p0 = scmp.ne.s32.totalorder %s3241_s17, %s3237_s16 }
  0x12   : > { %p57_p1 = scmp.eq.s32.totalorder %s3261_s22, 0  ;;  %p62_p2 = scmp.ne.s32.totalorder %s3237_s16, %s3233_s15 }
  0x13   : > { %p3359_p3 = scmp.eq.s32.totalorder %s2408_s23, 0  ;;  %p3363_p4 = scmp.eq.s32.totalorder %s2408_s23, 5 }
  0x14   : > { %p58_p5 = por %p57_p1, %p56_p0  ;;  %p2931_p7 = scmp.lt.s32.totalorder %s3261_s22, 6 }
  0x15   : > { %p3371_p6 = por %p3359_p3, %p62_p2  ;;  %s142_s29 = sand.u32 1, %s3241_s17  }
  0x16   : > { %s2815_s30 = sshll.u32 %s3257_s21, 9  ;;  %s2412_s3 = sshll.u32 %s142_s29, 9 }
  0x17   : > { %s3824_s0 = sld [smem:[#allocation18_spill]]  ;;  %s146_s8 = scalar_lea.vmem [#allocation3], %s2412_s3 }
  0x18   : > { %s157_s15 = sshll.u32 %s146_s8, 4  ;;  %p2921_p8 = pnand %p2931_p7, %p58_p5  ;;  %s158_s15 = int_to_ptr.vmem [resolvable:$true] %s157_s15 }
  0x19   : > { %p2419_p9 = scmp.ge.s32.totalorder %s3261_s22, 1  ;;  %p190_p10 = scmp.lt.s32.totalorder %s3261_s22, 7 }
  0x1a   : > { %s143_s23 = scalar_lea.sflag [#allocation4], %s142_s29  ;;  %s3810_s4 = smov 8  }
  0x1b   : > { %p3388_p11 = pnand %p2419_p9, %p190_p10  ;;  %s2409_s5 = sadd.s32 4294967294, %s3261_s22  }
  0x1c   : > { %s77_s8 = sadd.s32 1, %s3229_s14  ;;  %p84_p13 = scmp.ne.s32.totalorder %s3229_s14, %s3225_s13 }
  0x1d   : > { %s154_s6 = scalar_lea.hbm %s3824_s0, %s2815_s30  ;;  %s3809_s30 = smov 128  }
  0x1e   : > { %s155_s7 = sshll.u32 %s154_s6, 4  ;;  %s36_s6 = sadd.s32 1, %s3253_s20  ;;  %s156_s7 = int_to_ptr.hbm [resolvable:$true] %s155_s7 }
  0x1f   : > { %2923 = dma.hbm_to_vmem [thread:$0]  (!%p2921_p8), %s156_s7, 8192, %s158_s15, %s143_s23, %s3809_s30, %s3809_s30, %s3810_s4  }
  0x20   : > { %p38_p12 = scmp.ge.s32.totalorder %s36_s6, 3  ;;  %p90_p0 = scmp.ne.s32.totalorder %s3225_s13, %s3221_s12 }
  0x21   : > { %s105_s29 = sadd.s32 1, %s3217_s11  ;;  %p3409_p2 = por %p84_p13, %p57_p1 }
  0x22   : > { %s3857_s6 = smov (%p38_p12, %s36_s6), 0  ;;  %s3859_s24 = smov (!%p38_p12, %s40_s24), %s3257_s21 }
  0x23   : > { %3826 = sst [smem:[#allocation14_spill]] %s3857_s6  ;;  %s73_s7 = ssub.s32 %s3253_s20, %s3857_s6 }
  0x24   : > { %p42_p5 = scmp.ge.s32.totalorder %s3859_s24, 2  ;;  %p75_p8 = scmp.eq.s32.totalorder %s73_s7, 0 }
  0x25   : > { %p3415_p9 = por %p90_p0, %p3359_p3  ;;  %p115_p10 = scmp.ne.s32.totalorder %s3217_s11, %s3213_s10 }
  0x26   : > { %s3861_s24 = smov (%p42_p5, %s3859_s24), 0  ;;  %p121_p13 = scmp.ne.s32.totalorder %s3213_s10, %s3209_s9 }
  0x27   : > { %3829 = sst [smem:[#allocation15_spill]] %s3861_s24  ;;  %s44_s30 = ssub.s32 %s3257_s21, %s3861_s24 }
  0x28   : > { %s3424_s23 = scalar_select %p75_p8, %s3229_s14, %s77_s8  }
  0x29   : > { %p3430_p1 = por %p3363_p4, %p115_p10  ;;  %p47_p12 = scmp.eq.s32.totalorder %s44_s30, 0 }
  0x2a   : > { %3830 = sst [smem:[#allocation16_spill]] %s3424_s23  ;;  %s102_s26 = sor.u32 %s73_s7, %s44_s30 }
  0x2b   : > { %s3831_s4 = scalar_select %p3430_p1, 1, 0 }
  0x2c   : > { %p103_p3 = scmp.eq.s32.totalorder %s102_s26, 0  ;;  %p122_p0 = scmp.eq.s32.totalorder %s2409_s5, 5 }
  0x2d   : > { %3832 = sst [smem:[#allocation17_spill]] %s3831_s4  ;;  %s167_s8 = sand.u32 1, %s3229_s14  }
  0x2e   : > { %s3439_s0 = scalar_select %p47_p12, %s3241_s17, %s49_s25  }
  0x2f   : > { %s3442_s6 = scalar_select %p103_p3, %s3217_s11, %s105_s29  }
  0x30   : > { %s2416_s23 = sshll.u32 %s167_s8, 8  ;;  %p3445_p5 = por %p122_p0, %p121_p13 }
  0x31   : > { %s2816_s24 = sshll.u32 %s3253_s20, 3  ;;  %s171_s21 = scalar_lea.vmem [#allocation6], %s2416_s23 }
  0x32   : > { %s182_s4 = sshll.u32 %s171_s21, 4  ;;  %s179_s30 = scalar_lea.hbm %s3807_s1, %s2816_s24  ;;  %s183_s4 = int_to_ptr.vmem [resolvable:$true] %s182_s4 }
  0x33   : > { %s180_s7 = sshll.u32 %s179_s30, 4  ;;  %p2924_p4 = pnand %p2931_p7, %p3409_p2  ;;  %s181_s7 = int_to_ptr.hbm [resolvable:$true] %s180_s7 }
  0x34   : > { %s168_s25 = scalar_lea.sflag [#allocation7], %s167_s8  ;;  %s3265_s5 = smov 384  }
  0x35   : > { %s3834_s29 = smov 8   ;;  %s3835_s26 = smov 128  }
  0x36   : > { %2926 = dma.hbm_to_vmem [thread:$0]  (!%p2924_p4), %s181_s7, 4096, %s183_s4, %s168_s25, %s3265_s5, %s3835_s26, %s3834_s29  }
  0x37   : > { %194 = sbr.rel (%p3388_p11) target bundleno = 747 (0x2eb), region = 28  ;;  %s196_s21 = sand.u32 (!%p3388_p11), 1, %s3237_s16  }
  0x38   : > { %s2420_s23 = sshll.u32 (!%p3388_p11), %s196_s21, 9  ;;  %s197_s2 = scalar_lea.sflag (!%p3388_p11), [#allocation4], %s196_s21 }
  0x39   : > { %s3462_s18 = scalar_lea.vmem (!%p3388_p11), [#allocation3], %s2420_s23 }
  0x3c   : > { %3196 = dma.done.wait (%p3371_p6), %s197_s2, 8192  }
  0x3d   : > { %3198 = vsyncadd (%p3371_p6), %s197_s2, 4294959104  ;;  %s206_s24 = sand.u32 1, %s3225_s13  }
  0x3e   : > { %s2421_s15 = sshll.u32 %s206_s24, 8  ;;  %s207_s4 = scalar_lea.sflag [#allocation7], %s206_s24 }
  0x3f   : > { %s3469_s8 = scalar_lea.vmem [#allocation6], %s2421_s15 }
  0x40   : > { %3200 = dma.done.wait (%p3415_p9), %s207_s4, 4096  }
  0x41   : > { %3202 = vsyncadd (%p3415_p9), %s207_s4, 4294963200  ;;  %v2737_v0 = vld [vmem:[%s3469_s8 + $0x70] sm:$0xf]  ;;  %v2896_v1 = vld [vmem:[%s3469_s8 + $0x74] sm:$0xf0]  ;;  %s234_s28 = sand.u32 1, %s3213_s10  }
  0x42   : > { %v2801_v2 = vld [vmem:[%s3469_s8 + $0xf0] sm:$0xf]  ;;  %v2738_v3 = vor.u32 %v2896_v1, %v2737_v0  ;;  %v2912_v4 = vld [vmem:[%s3469_s8 + $0xf4] sm:$0xf0]  ;;  %v2895_v5 = vld [vmem:[%s3469_s8 + $0x74] sm:$0xf] }
  0x43   : > { %v2739_v6 = vld [vmem:[%s3469_s8 + $0x78] sm:$0xf0]  ;;  %v2802_v7 = vor.u32 %v2912_v4, %v2801_v2  ;;  %v2911_v9 = vld [vmem:[%s3469_s8 + $0xf4] sm:$0xf]  ;;  %v2729_v11 = vld [vmem:[%s3469_s8 + $0x60] sm:$0xf] }
  0x44   : > { %v2742_v8 = vor.u32 %v2895_v5, %v2739_v6  ;;  %v2803_v10 = vld [vmem:[%s3469_s8 + $0xf8] sm:$0xf0]  ;;  %1079 = vmatpush.bf16.msra.mxu0 %v2738_v3  ;;  %v2894_v13 = vld [vmem:[%s3469_s8 + $0x64] sm:$0xf0]  ;;  %v2793_v14 = vld [vmem:[%s3469_s8 + $0xe0] sm:$0xf] }
  0x45   : > { %v2806_v12 = vor.u32 %v2911_v9, %v2803_v10  ;;  %v2910_v15 = vld [vmem:[%s3469_s8 + $0xe4] sm:$0xf0]  ;;  %1248 = vmatpush.bf16.msra.mxu1 %v2802_v7  ;;  %v2730_v16 = vor.u32 %v2894_v13, %v2729_v11  ;;  %v2893_v18 = vld [vmem:[%s3469_s8 + $0x64] sm:$0xf]  ;;  %v2731_v19 = vld [vmem:[%s3469_s8 + $0x68] sm:$0xf0] }
  0x46   : > { %1417 = vmatpush.bf16.msra.mxu2 %v2742_v8  ;;  %v2794_v17 = vor.u32 %v2910_v15, %v2793_v14  ;;  %v2909_v20 = vld [vmem:[%s3469_s8 + $0xe4] sm:$0xf]  ;;  %v2734_v21 = vor.u32 %v2893_v18, %v2731_v19  ;;  %v2795_v22 = vld [vmem:[%s3469_s8 + $0xe8] sm:$0xf0]  ;;  %v2721_v23 = vld [vmem:[%s3469_s8 + $0x50] sm:$0xf] }
  0x47   : > { %1586 = vmatpush.bf16.msra.mxu3 %v2806_v12  ;;  %v2892_v24 = vld [vmem:[%s3469_s8 + $0x54] sm:$0xf0]  ;;  %v2798_v25 = vor.u32 %v2909_v20, %v2795_v22  ;;  %v2785_v26 = vld [vmem:[%s3469_s8 + $0xd0] sm:$0xf]  ;;  %v2891_v28 = vld [vmem:[%s3469_s8 + $0x54] sm:$0xf] }
  0x48   : > { %v2908_v27 = vld [vmem:[%s3469_s8 + $0xd4] sm:$0xf0]  ;;  %1080 = vmatpush.bf16.msra.mxu0 %v2730_v16  ;;  %v2722_v29 = vor.u32 %v2892_v24, %v2721_v23  ;;  %v2723_v30 = vld [vmem:[%s3469_s8 + $0x58] sm:$0xf0]  ;;  %v2907_v31 = vld [vmem:[%s3469_s8 + $0xd4] sm:$0xf] }
  0x49   : > { %v2787_v32 = vld [vmem:[%s3469_s8 + $0xd8] sm:$0xf0]  ;;  %1249 = vmatpush.bf16.msra.mxu1 %v2794_v17  ;;  %v2786_v33 = vor.u32 %v2908_v27, %v2785_v26  ;;  %v2726_v34 = vor.u32 %v2891_v28, %v2723_v30  ;;  %v2713_v35 = vld [vmem:[%s3469_s8 + $0x40] sm:$0xf]  ;;  %v2890_v36 = vld [vmem:[%s3469_s8 + $0x44] sm:$0xf0] }
  0x4a   : > { %1418 = vmatpush.bf16.msra.mxu2 %v2734_v21  ;;  %v2777_v37 = vld [vmem:[%s3469_s8 + $0xc0] sm:$0xf]  ;;  %v2790_v38 = vor.u32 %v2907_v31, %v2787_v32  ;;  %v2906_v39 = vld [vmem:[%s3469_s8 + $0xc4] sm:$0xf0]  ;;  %v2889_v40 = vld [vmem:[%s3469_s8 + $0x44] sm:$0xf]  ;;  %v2714_v44 = vor.u32 %v2890_v36, %v2713_v35 }
  0x4b   : > { %1587 = vmatpush.bf16.msra.mxu3 %v2798_v25  ;;  %v2715_v41 = vld [vmem:[%s3469_s8 + $0x48] sm:$0xf0]  ;;  %v2905_v42 = vld [vmem:[%s3469_s8 + $0xc4] sm:$0xf]  ;;  %v2778_v45 = vor.u32 %v2906_v39, %v2777_v37  ;;  %v2705_v47 = vld [vmem:[%s3469_s8 + $0x30] sm:$0xf] }
  0x4c   : > { %v2779_v43 = vld [vmem:[%s3469_s8 + $0xc8] sm:$0xf0]  ;;  %1081 = vmatpush.bf16.msra.mxu0 %v2722_v29  ;;  %v2718_v46 = vor.u32 %v2889_v40, %v2715_v41  ;;  %v2888_v48 = vld [vmem:[%s3469_s8 + $0x34] sm:$0xf0]  ;;  %v2769_v49 = vld [vmem:[%s3469_s8 + $0xb0] sm:$0xf] }
  0x4d   : > { %1250 = vmatpush.bf16.msra.mxu1 %v2786_v33  ;;  %v2782_v50 = vor.u32 %v2905_v42, %v2779_v43  ;;  %v2904_v51 = vld [vmem:[%s3469_s8 + $0xb4] sm:$0xf0]  ;;  %v2887_v52 = vld [vmem:[%s3469_s8 + $0x34] sm:$0xf]  ;;  %v2707_v53 = vld [vmem:[%s3469_s8 + $0x38] sm:$0xf0]  ;;  %v2706_v56 = vor.u32 %v2888_v48, %v2705_v47 }
  0x4e   : > { %1419 = vmatpush.bf16.msra.mxu2 %v2726_v34  ;;  %v2903_v54 = vld [vmem:[%s3469_s8 + $0xb4] sm:$0xf]  ;;  %v2771_v55 = vld [vmem:[%s3469_s8 + $0xb8] sm:$0xf0]  ;;  %v2770_v57 = vor.u32 %v2904_v51, %v2769_v49  ;;  %v2710_v58 = vor.u32 %v2887_v52, %v2707_v53  ;;  %v2697_v59 = vld [vmem:[%s3469_s8 + $0x20] sm:$0xf] }
  0x4f   : > { %1588 = vmatpush.bf16.msra.mxu3 %v2790_v38  ;;  %v2886_v60 = vld [vmem:[%s3469_s8 + $0x24] sm:$0xf0]  ;;  %v2761_v61 = vld [vmem:[%s3469_s8 + $0xa0] sm:$0xf]  ;;  %v2774_v62 = vor.u32 %v2903_v54, %v2771_v55  ;;  %v2885_v0 = vld [vmem:[%s3469_s8 + $0x24] sm:$0xf] }
  0x50   : > { %1082 = vmatpush.bf16.msra.mxu0 %v2714_v44  ;;  %v2902_v63 = vld [vmem:[%s3469_s8 + $0xa4] sm:$0xf0]  ;;  %v2699_v1 = vld [vmem:[%s3469_s8 + $0x28] sm:$0xf0]  ;;  %v2901_v2 = vld [vmem:[%s3469_s8 + $0xa4] sm:$0xf]  ;;  %v2698_v4 = vor.u32 %v2886_v60, %v2697_v59 }
  0x51   : > { %1251 = vmatpush.bf16.msra.mxu1 %v2778_v45  ;;  %v2763_v3 = vld [vmem:[%s3469_s8 + $0xa8] sm:$0xf0]  ;;  %v2762_v5 = vor.u32 %v2902_v63, %v2761_v61  ;;  %v2702_v6 = vor.u32 %v2885_v0, %v2699_v1  ;;  %v2689_v7 = vld [vmem:[%s3469_s8 + $0x10] sm:$0xf]  ;;  %v2884_v8 = vld [vmem:[%s3469_s8 + $0x14] sm:$0xf0] }
  0x52   : > { %1420 = vmatpush.bf16.msra.mxu2 %v2718_v46  ;;  %v2753_v9 = vld [vmem:[%s3469_s8 + $0x90] sm:$0xf]  ;;  %v2766_v10 = vor.u32 %v2901_v2, %v2763_v3  ;;  %v2900_v11 = vld [vmem:[%s3469_s8 + $0x94] sm:$0xf0]  ;;  %v2883_v12 = vld [vmem:[%s3469_s8 + $0x14] sm:$0xf]  ;;  %v2690_v16 = vor.u32 %v2884_v8, %v2689_v7 }
  0x53   : > { %1589 = vmatpush.bf16.msra.mxu3 %v2782_v50  ;;  %v2691_v13 = vld [vmem:[%s3469_s8 + $0x18] sm:$0xf0]  ;;  %v2899_v14 = vld [vmem:[%s3469_s8 + $0x94] sm:$0xf]  ;;  %v2754_v17 = vor.u32 %v2900_v11, %v2753_v9  ;;  %v2681_v19 = vld [vmem:[%s3469_s8] sm:$0xf] }
  0x54   : > { %1083 = vmatpush.bf16.msra.mxu0 %v2706_v56  ;;  %v2755_v15 = vld [vmem:[%s3469_s8 + $0x98] sm:$0xf0]  ;;  %v2694_v18 = vor.u32 %v2883_v12, %v2691_v13  ;;  %v2882_v20 = vld [vmem:[%s3469_s8 + $0x4] sm:$0xf0]  ;;  %v2745_v21 = vld [vmem:[%s3469_s8 + $0x80] sm:$0xf] }
  0x55   : > { %1252 = vmatpush.bf16.msra.mxu1 %v2770_v57  ;;  %v2758_v22 = vor.u32 %v2899_v14, %v2755_v15  ;;  %v2898_v23 = vld [vmem:[%s3469_s8 + $0x84] sm:$0xf0]  ;;  %v2881_v24 = vld [vmem:[%s3469_s8 + $0x4] sm:$0xf]  ;;  %v2683_v25 = vld [vmem:[%s3469_s8 + $0x8] sm:$0xf0]  ;;  %v2682_v28 = vor.u32 %v2882_v20, %v2681_v19 }
  0x56   : > { %1421 = vmatpush.bf16.msra.mxu2 %v2710_v58  ;;  %v2897_v26 = vld [vmem:[%s3469_s8 + $0x84] sm:$0xf]  ;;  %v2747_v27 = vld [vmem:[%s3469_s8 + $0x88] sm:$0xf0]  ;;  %v2425_v29 = vld [vmem:[%s3462_s18] sm:$0xf]  ;;  %v2746_v31 = vor.u32 %v2898_v23, %v2745_v21  ;;  %v2686_v32 = vor.u32 %v2881_v24, %v2683_v25 }
  0x57   : > { %1590 = vmatpush.bf16.msra.mxu3 %v2774_v62  ;;  %v2818_v30 = vld [vmem:[%s3462_s18 + $0x4] sm:$0xf0]  ;;  %v2817_v33 = vld [vmem:[%s3462_s18 + $0x4] sm:$0xf]  ;;  %v2427_v34 = vld [vmem:[%s3462_s18 + $0x8] sm:$0xf0]  ;;  %v2750_v35 = vor.u32 %v2897_v26, %v2747_v27 }
  0x58   : > { %1084 = vmatpush.bf16.msra.mxu0 %v2698_v4  ;;  %v2426_v36 = vor.u32 %v2818_v30, %v2425_v29  ;;  %v2430_v37 = vor.u32 %v2817_v33, %v2427_v34  ;;  %v2433_v38 = vld [vmem:[%s3462_s18 + $0x10] sm:$0xf]  ;;  %v2820_v39 = vld [vmem:[%s3462_s18 + $0x14] sm:$0xf0]  ;;  %v2819_v40 = vld [vmem:[%s3462_s18 + $0x14] sm:$0xf] }
  0x59   : > { %1253 = vmatpush.bf16.msra.mxu1 %v2762_v5  ;;  %v2435_v41 = vld [vmem:[%s3462_s18 + $0x18] sm:$0xf0]  ;;  %v2434_v42 = vor.u32 %v2820_v39, %v2433_v38  ;;  %v2441_v44 = vld [vmem:[%s3462_s18 + $0x20] sm:$0xf]  ;;  %v2822_v45 = vld [vmem:[%s3462_s18 + $0x24] sm:$0xf0] }
  0x5a   : > { %1422 = vmatpush.bf16.msra.mxu2 %v2702_v6  ;;  %v2438_v43 = vor.u32 %v2819_v40, %v2435_v41  ;;  %v2821_v46 = vld [vmem:[%s3462_s18 + $0x24] sm:$0xf]  ;;  %v2443_v47 = vld [vmem:[%s3462_s18 + $0x28] sm:$0xf0]  ;;  %v2442_v48 = vor.u32 %v2822_v45, %v2441_v44  ;;  %v2449_v50 = vld [vmem:[%s3462_s18 + $0x30] sm:$0xf] }
  0x5b   : > { %1591 = vmatpush.bf16.msra.mxu3 %v2766_v10  ;;  %v2446_v49 = vor.u32 %v2821_v46, %v2443_v47  ;;  %v2824_v51 = vld [vmem:[%s3462_s18 + $0x34] sm:$0xf0]  ;;  %v2823_v52 = vld [vmem:[%s3462_s18 + $0x34] sm:$0xf]  ;;  %v2451_v53 = vld [vmem:[%s3462_s18 + $0x38] sm:$0xf0] }
  0x5c   : > { %1085 = vmatpush.bf16.msra.mxu0 %v2690_v16  ;;  %v2450_v54 = vor.u32 %v2824_v51, %v2449_v50  ;;  %v2454_v55 = vor.u32 %v2823_v52, %v2451_v53  ;;  %v2457_v56 = vld [vmem:[%s3462_s18 + $0x40] sm:$0xf]  ;;  %v2826_v57 = vld [vmem:[%s3462_s18 + $0x44] sm:$0xf0]  ;;  %v2825_v58 = vld [vmem:[%s3462_s18 + $0x44] sm:$0xf] }
  0x5d   : > { %1254 = vmatpush.bf16.msra.mxu1 %v2754_v17  ;;  %v2459_v59 = vld [vmem:[%s3462_s18 + $0x48] sm:$0xf0]  ;;  %v2458_v60 = vor.u32 %v2826_v57, %v2457_v56  ;;  %v2465_v62 = vld [vmem:[%s3462_s18 + $0x50] sm:$0xf]  ;;  %v2828_v63 = vld [vmem:[%s3462_s18 + $0x54] sm:$0xf0] }
  0x5e   : > { %1423 = vmatpush.bf16.msra.mxu2 %v2694_v18  ;;  %v2462_v61 = vor.u32 %v2825_v58, %v2459_v59  ;;  %v2827_v0 = vld [vmem:[%s3462_s18 + $0x54] sm:$0xf]  ;;  %v2467_v1 = vld [vmem:[%s3462_s18 + $0x58] sm:$0xf0]  ;;  %v2466_v2 = vor.u32 %v2828_v63, %v2465_v62  ;;  %v2473_v4 = vld [vmem:[%s3462_s18 + $0x60] sm:$0xf] }
  0x5f   : > { %1592 = vmatpush.bf16.msra.mxu3 %v2758_v22  ;;  %v2470_v3 = vor.u32 %v2827_v0, %v2467_v1  ;;  %v2830_v5 = vld [vmem:[%s3462_s18 + $0x64] sm:$0xf0]  ;;  %v2829_v6 = vld [vmem:[%s3462_s18 + $0x64] sm:$0xf]  ;;  %v2475_v7 = vld [vmem:[%s3462_s18 + $0x68] sm:$0xf0] }
  0x60   : > { %1086 = vmatpush.bf16.msra.mxu0 %v2682_v28  ;;  %v2474_v8 = vor.u32 %v2830_v5, %v2473_v4  ;;  %v2478_v9 = vor.u32 %v2829_v6, %v2475_v7  ;;  %v2481_v10 = vld [vmem:[%s3462_s18 + $0x70] sm:$0xf]  ;;  %v2832_v11 = vld [vmem:[%s3462_s18 + $0x74] sm:$0xf0]  ;;  %v2831_v12 = vld [vmem:[%s3462_s18 + $0x74] sm:$0xf] }
  0x61   : > { %1255 = vmatpush.bf16.msra.mxu1 %v2746_v31  ;;  %v2483_v13 = vld [vmem:[%s3462_s18 + $0x78] sm:$0xf0]  ;;  %v2482_v14 = vor.u32 %v2832_v11, %v2481_v10  ;;  %v2489_v16 = vld [vmem:[%s3462_s18 + $0x80] sm:$0xf]  ;;  %v2834_v17 = vld [vmem:[%s3462_s18 + $0x84] sm:$0xf0] }
  0x62   : > { %1424 = vmatpush.bf16.msra.mxu2 %v2686_v32  ;;  %v2486_v15 = vor.u32 %v2831_v12, %v2483_v13  ;;  %v2833_v18 = vld [vmem:[%s3462_s18 + $0x84] sm:$0xf]  ;;  %v2491_v19 = vld [vmem:[%s3462_s18 + $0x88] sm:$0xf0]  ;;  %v2490_v20 = vor.u32 %v2834_v17, %v2489_v16  ;;  %s2422_s3 = sshll.u32 %s234_s28, 9  ;;  %s3836_s30 = sld [smem:[#allocation12_spill]] }
  0x63   : > { %1593 = vmatpush.bf16.msra.mxu3 %v2750_v35  ;;  %1087 = vmatmul.bf16.vlgmr.msra.gmra.mxu0 %v2426_v36  ;;  %v2494_v22 = vor.u32 %v2833_v18, %v2491_v19  ;;  %v2497_v31 = vld [vmem:[%s3462_s18 + $0x90] sm:$0xf]  ;;  %v2836_v32 = vld [vmem:[%s3462_s18 + $0x94] sm:$0xf0]  ;;  %s3580_s12 = scalar_lea.vmem [#allocation8], %s2422_s3  ;;  %s2913_s7 = smul.u32 384, %s3249_s19 }
  0x64   : > { %1256 = vmatmul.bf16.vlgmr.msra.gmra.mxu1 %v2430_v37  ;;  %v2835_v33 = vld [vmem:[%s3462_s18 + $0x94] sm:$0xf]  ;;  %v2499_v34 = vld [vmem:[%s3462_s18 + $0x98] sm:$0xf0]  ;;  %v2505_v51 = vld [vmem:[%s3462_s18 + $0xa0] sm:$0xf] }
  0x65   : > { %1425 = vmatmul.bf16.vlgmr.msra.gmra.mxu2 %v2426_v36  ;;  %v2498_v36 = vor.u32 %v2836_v32, %v2497_v31  ;;  %v2502_v39 = vor.u32 %v2835_v33, %v2499_v34  ;;  %v2838_v52 = vld [vmem:[%s3462_s18 + $0xa4] sm:$0xf0]  ;;  %v2837_v53 = vld [vmem:[%s3462_s18 + $0xa4] sm:$0xf]  ;;  %v2513_v7 = vld [vmem:[%s3462_s18 + $0xb0] sm:$0xf] }
  0x66   : > { %1594 = vmatmul.bf16.vlgmr.msra.gmra.mxu3 %v2430_v37  ;;  %v2506_v56 = vor.u32 %v2838_v52, %v2505_v51  ;;  %v2515_v10 = vld [vmem:[%s3462_s18 + $0xb8] sm:$0xf0]  ;;  %s3837_s23 = sld [smem:[#allocation19_spill]]  ;;  %s2271_s15 = scalar_lea.sflag [#allocation5], %s234_s28 }
  0x68   : > { %s2809_s25 = sshll.u32 %s3836_s30, 1 }
  0x69   : > { %s2283_s5 = sadd.s32 %s2913_s7, %s2809_s25 }
  0x6a   : > { %s2811_s29 = sshll.u32 %s2283_s5, 2 }
  0x6c   : > { %s2285_s2 = scalar_lea.hbm %s3837_s23, %s2811_s29  ;;  %s3131_s7 = scalar_lea.hbm %s3837_s23, 3072 }
  0x6d   : > { %s2288_s24 = sshll.u32 %s2285_s2, 4  ;;  %s2289_s24 = int_to_ptr.hbm [resolvable:$true] %s2288_s24 }
  0x6e   : > { %s3125_s4 = sshra.s32 %s2289_s24, 4  ;;  %s3126_s4 = int_to_ptr.hbm [resolvable:$true] %s3125_s4 }
  0x6f   : > { %s3127_s8 = scalar_lea.hbm %s3126_s4, 512  ;;  %p3132_p2 = scmp.lt.s32.totalorder %s3126_s4, %s3837_s23 }
  0x70   : > { %p3128_p6 = scmp.ne.s32.totalorder %s3126_s4, %s3127_s8  ;;  %p3133_p8 = scmp.lt.s32.totalorder %s3131_s7, %s3127_s8 }
  0x72   : > { %p3129_p7 = pnand %p3128_p6, %p3430_p1  ;;  %p3134_p9 = por %p3133_p8, %p3132_p2 }
  0x73   : > { %1092 = vmatmul.bf16.gmra.mxu0 %v2434_v42 }
  0x74   : > { %1261 = vmatmul.bf16.gmra.mxu1 %v2438_v43  ;;  %p3130_p11 = pneg %p3129_p7 }
  0x75   : > { %1430 = vmatmul.bf16.gmra.mxu2 %v2434_v42 }
  0x76   : > { %1599 = vmatmul.bf16.gmra.mxu3 %v2438_v43  ;;  %p3135_p10 = pnand %p3134_p9, %p3130_p11 }
  0x83   : > { %1097 = vmatmul.bf16.gmra.mxu0 %v2442_v48 }
  0x84   : > { %1266 = vmatmul.bf16.gmra.mxu1 %v2446_v49 }
  0x85   : > { %1435 = vmatmul.bf16.gmra.mxu2 %v2442_v48 }
  0x86   : > { %1604 = vmatmul.bf16.gmra.mxu3 %v2446_v49 }
  0x93   : > { %1102 = vmatmul.bf16.gmra.mxu0 %v2450_v54 }
  0x94   : > { %1271 = vmatmul.bf16.gmra.mxu1 %v2454_v55 }
  0x95   : > { %1440 = vmatmul.bf16.gmra.mxu2 %v2450_v54  ;;  %v2507_v54 = vld [vmem:[%s3462_s18 + $0xa8] sm:$0xf0] }
  0x96   : > { %1609 = vmatmul.bf16.gmra.mxu3 %v2454_v55  ;;  %v2510_v59 = vor.u32 %v2837_v53, %v2507_v54 }
  0xa3   : > { %1107 = vmatmul.bf16.gmra.mxu0 %v2458_v60 }
  0xa4   : > { %1276 = vmatmul.bf16.gmra.mxu1 %v2462_v61 }
  0xa5   : > { %1445 = vmatmul.bf16.gmra.mxu2 %v2458_v60 }
  0xa6   : > { %1614 = vmatmul.bf16.gmra.mxu3 %v2462_v61 }
  0xb3   : > { %1112 = vmatmul.bf16.gmra.mxu0 %v2466_v2 }
  0xb4   : > { %1281 = vmatmul.bf16.gmra.mxu1 %v2470_v3 }
  0xb5   : > { %1450 = vmatmul.bf16.gmra.mxu2 %v2466_v2 }
  0xb6   : > { %1619 = vmatmul.bf16.gmra.mxu3 %v2470_v3 }
  0xc3   : > { %1117 = vmatmul.bf16.gmra.mxu0 %v2474_v8 }
  0xc4   : > { %1286 = vmatmul.bf16.gmra.mxu1 %v2478_v9 }
  0xc5   : > { %1455 = vmatmul.bf16.gmra.mxu2 %v2474_v8  ;;  %v2840_v8 = vld [vmem:[%s3462_s18 + $0xb4] sm:$0xf0] }
  0xc6   : > { %1624 = vmatmul.bf16.gmra.mxu3 %v2478_v9  ;;  %v2839_v9 = vld [vmem:[%s3462_s18 + $0xb4] sm:$0xf]  ;;  %v2514_v12 = vor.u32 %v2840_v8, %v2513_v7 }
  0xd3   : > { %1122 = vmatmul.bf16.gmra.mxu0 %v2482_v14 }
  0xd4   : > { %1291 = vmatmul.bf16.gmra.mxu1 %v2486_v15 }
  0xd5   : > { %1460 = vmatmul.bf16.gmra.mxu2 %v2482_v14 }
  0xd6   : > { %1629 = vmatmul.bf16.gmra.mxu3 %v2486_v15  ;;  %v2518_v15 = vor.u32 %v2839_v9, %v2515_v10 }
  0xe0   : > { %v1088_v21 = vpop.f32.mrf.mxu0 }
  0xe1   : > { %v1257_v23 = vpop.f32.mrf.mxu1 }
  0xe2   : > { %v1258_v24 = vadd.f32 %v1257_v23, %v1088_v21 }
  0xe3   : > { %1127 = vmatmul.bf16.gmra.mxu0 %v2490_v20 }
  0xe4   : > { %1296 = vmatmul.bf16.gmra.mxu1 %v2494_v22 }
  0xe5   : > { %1465 = vmatmul.bf16.gmra.mxu2 %v2490_v20 }
  0xe6   : > { %1634 = vmatmul.bf16.gmra.mxu3 %v2494_v22 }
  0xe8   : > { %v1426_v25 = vpop.f32.mrf.mxu2  ;;  %v1090_v27 = vpop.f32.mrf.mxu0 }
  0xe9   : > { %v1595_v26 = vpop.f32.mrf.mxu3  ;;  %v1259_v29 = vpop.f32.mrf.mxu1 }
  0xea   : > { %v1596_v28 = vadd.f32 %v1595_v26, %v1426_v25  ;;  %v1260_v40 = vadd.f32 %v1259_v29, %v1090_v27  ;;  %v2521_v27 = vld [vmem:[%s3462_s18 + $0xc0] sm:$0xf]  ;;  %v2841_v29 = vld [vmem:[%s3462_s18 + $0xc4] sm:$0xf] }
  0xec   : > { %v2142_v30 = vpack.c.bf16 %v1596_v28, %v1258_v24  ;;  %v2842_v28 = vld [vmem:[%s3462_s18 + $0xc4] sm:$0xf0] }
  0xed   : > { %v2522_v32 = vor.u32 %v2842_v28, %v2521_v27 }
  0xee   : > { %2206 = vst [vmem:[%s3580_s12] sm:$0xff] %v2142_v30  ;;  %v2523_v30 = vld [vmem:[%s3462_s18 + $0xc8] sm:$0xf0] }
  0xf0   : > { %v1428_v35 = vpop.f32.mrf.mxu2  ;;  %v1093_v38 = vpop.f32.mrf.mxu0 }
  0xf1   : > { %v1597_v37 = vpop.f32.mrf.mxu3  ;;  %v1262_v42 = vpop.f32.mrf.mxu1 }
  0xf2   : > { %v1598_v41 = vadd.f32 %v1597_v37, %v1428_v35  ;;  %v1263_v44 = vadd.f32 %v1262_v42, %v1093_v38  ;;  %v2526_v35 = vor.u32 %v2841_v29, %v2523_v30 }
  0xf3   : > { %1132 = vmatmul.bf16.gmra.mxu0 %v2498_v36 }
  0xf4   : > { %v2143_v43 = vpack.c.bf16 %v1598_v41, %v1260_v40  ;;  %1301 = vmatmul.bf16.gmra.mxu1 %v2502_v39 }
  0xf5   : > { %1470 = vmatmul.bf16.gmra.mxu2 %v2498_v36 }
  0xf6   : > { %2207 = vst [vmem:[%s3580_s12 + $0x8] sm:$0xff] %v2143_v43  ;;  %1639 = vmatmul.bf16.gmra.mxu3 %v2502_v39 }
  0xf8   : > { %v1431_v45 = vpop.f32.mrf.mxu2  ;;  %v1095_v47 = vpop.f32.mrf.mxu0 }
  0xf9   : > { %v1600_v46 = vpop.f32.mrf.mxu3  ;;  %v1264_v49 = vpop.f32.mrf.mxu1 }
  0xfa   : > { %v1601_v48 = vadd.f32 %v1600_v46, %v1431_v45  ;;  %v1265_v60 = vadd.f32 %v1264_v49, %v1095_v47  ;;  %v2529_v47 = vld [vmem:[%s3462_s18 + $0xd0] sm:$0xf]  ;;  %v2843_v49 = vld [vmem:[%s3462_s18 + $0xd4] sm:$0xf] }
  0xfc   : > { %v2144_v50 = vpack.c.bf16 %v1601_v48, %v1263_v44  ;;  %v2844_v48 = vld [vmem:[%s3462_s18 + $0xd4] sm:$0xf0] }
  0xfd   : > { %v2530_v52 = vor.u32 %v2844_v48, %v2529_v47 }
  0xfe   : > { %2208 = vst [vmem:[%s3580_s12 + $0x10] sm:$0xff] %v2144_v50  ;;  %v2531_v50 = vld [vmem:[%s3462_s18 + $0xd8] sm:$0xf0] }
 0x100   : > { %v1433_v55 = vpop.f32.mrf.mxu2  ;;  %v1098_v58 = vpop.f32.mrf.mxu0 }
 0x101   : > { %v1602_v57 = vpop.f32.mrf.mxu3  ;;  %v1267_v62 = vpop.f32.mrf.mxu1 }
 0x102   : > { %v1603_v61 = vadd.f32 %v1602_v57, %v1433_v55  ;;  %v1268_v0 = vadd.f32 %v1267_v62, %v1098_v58  ;;  %v2534_v55 = vor.u32 %v2843_v49, %v2531_v50 }
 0x103   : > { %1137 = vmatmul.bf16.gmra.mxu0 %v2506_v56 }
 0x104   : > { %v2145_v63 = vpack.c.bf16 %v1603_v61, %v1265_v60  ;;  %1306 = vmatmul.bf16.gmra.mxu1 %v2510_v59 }
 0x105   : > { %1475 = vmatmul.bf16.gmra.mxu2 %v2506_v56 }
 0x106   : > { %2209 = vst [vmem:[%s3580_s12 + $0x18] sm:$0xff] %v2145_v63  ;;  %1644 = vmatmul.bf16.gmra.mxu3 %v2510_v59 }
 0x108   : > { %v1436_v1 = vpop.f32.mrf.mxu2  ;;  %v1100_v3 = vpop.f32.mrf.mxu0 }
 0x109   : > { %v1605_v2 = vpop.f32.mrf.mxu3  ;;  %v1269_v5 = vpop.f32.mrf.mxu1 }
 0x10a   : > { %v1606_v4 = vadd.f32 %v1605_v2, %v1436_v1  ;;  %v1270_v16 = vadd.f32 %v1269_v5, %v1100_v3  ;;  %v2537_v3 = vld [vmem:[%s3462_s18 + $0xe0] sm:$0xf]  ;;  %v2845_v5 = vld [vmem:[%s3462_s18 + $0xe4] sm:$0xf] }
 0x10c   : > { %v2146_v6 = vpack.c.bf16 %v1606_v4, %v1268_v0  ;;  %v2846_v4 = vld [vmem:[%s3462_s18 + $0xe4] sm:$0xf0] }
 0x10d   : > { %v2538_v8 = vor.u32 %v2846_v4, %v2537_v3 }
 0x10e   : > { %2210 = vst [vmem:[%s3580_s12 + $0x20] sm:$0xff] %v2146_v6  ;;  %v2539_v6 = vld [vmem:[%s3462_s18 + $0xe8] sm:$0xf0] }
 0x110   : > { %v1438_v11 = vpop.f32.mrf.mxu2  ;;  %v1103_v14 = vpop.f32.mrf.mxu0 }
 0x111   : > { %v1607_v13 = vpop.f32.mrf.mxu3  ;;  %v1272_v18 = vpop.f32.mrf.mxu1 }
 0x112   : > { %v1608_v17 = vadd.f32 %v1607_v13, %v1438_v11  ;;  %v1273_v20 = vadd.f32 %v1272_v18, %v1103_v14  ;;  %v2542_v11 = vor.u32 %v2845_v5, %v2539_v6 }
 0x113   : > { %1142 = vmatmul.bf16.gmra.mxu0 %v2514_v12 }
 0x114   : > { %v2147_v19 = vpack.c.bf16 %v1608_v17, %v1270_v16  ;;  %1311 = vmatmul.bf16.gmra.mxu1 %v2518_v15 }
 0x115   : > { %1480 = vmatmul.bf16.gmra.mxu2 %v2514_v12 }
 0x116   : > { %2211 = vst [vmem:[%s3580_s12 + $0x28] sm:$0xff] %v2147_v19  ;;  %1649 = vmatmul.bf16.gmra.mxu3 %v2518_v15 }
 0x118   : > { %v1441_v21 = vpop.f32.mrf.mxu2  ;;  %v1105_v23 = vpop.f32.mrf.mxu0 }
 0x119   : > { %v1610_v22 = vpop.f32.mrf.mxu3  ;;  %v1274_v25 = vpop.f32.mrf.mxu1 }
 0x11a   : > { %v1611_v24 = vadd.f32 %v1610_v22, %v1441_v21  ;;  %v1275_v36 = vadd.f32 %v1274_v25, %v1105_v23  ;;  %v2545_v23 = vld [vmem:[%s3462_s18 + $0xf0] sm:$0xf]  ;;  %v2847_v25 = vld [vmem:[%s3462_s18 + $0xf4] sm:$0xf] }
 0x11c   : > { %v2148_v26 = vpack.c.bf16 %v1611_v24, %v1273_v20  ;;  %v2848_v24 = vld [vmem:[%s3462_s18 + $0xf4] sm:$0xf0] }
 0x11d   : > { %v2546_v28 = vor.u32 %v2848_v24, %v2545_v23 }
 0x11e   : > { %2212 = vst [vmem:[%s3580_s12 + $0x30] sm:$0xff] %v2148_v26  ;;  %v2547_v26 = vld [vmem:[%s3462_s18 + $0xf8] sm:$0xf0] }
 0x120   : > { %v1443_v31 = vpop.f32.mrf.mxu2  ;;  %v1108_v34 = vpop.f32.mrf.mxu0 }
 0x121   : > { %v1612_v33 = vpop.f32.mrf.mxu3  ;;  %v1277_v38 = vpop.f32.mrf.mxu1 }
 0x122   : > { %v1613_v37 = vadd.f32 %v1612_v33, %v1443_v31  ;;  %v1278_v40 = vadd.f32 %v1277_v38, %v1108_v34  ;;  %v2550_v31 = vor.u32 %v2847_v25, %v2547_v26 }
 0x123   : > { %1147 = vmatmul.bf16.gmra.mxu0 %v2522_v32 }
 0x124   : > { %v2149_v39 = vpack.c.bf16 %v1613_v37, %v1275_v36  ;;  %1316 = vmatmul.bf16.gmra.mxu1 %v2526_v35 }
 0x125   : > { %1485 = vmatmul.bf16.gmra.mxu2 %v2522_v32 }
 0x126   : > { %2213 = vst [vmem:[%s3580_s12 + $0x38] sm:$0xff] %v2149_v39  ;;  %1654 = vmatmul.bf16.gmra.mxu3 %v2526_v35 }
 0x128   : > { %v1446_v41 = vpop.f32.mrf.mxu2  ;;  %v1110_v43 = vpop.f32.mrf.mxu0 }
 0x129   : > { %v1615_v42 = vpop.f32.mrf.mxu3  ;;  %v1279_v45 = vpop.f32.mrf.mxu1 }
 0x12a   : > { %v1616_v44 = vadd.f32 %v1615_v42, %v1446_v41  ;;  %v1280_v56 = vadd.f32 %v1279_v45, %v1110_v43  ;;  %v2553_v43 = vld [vmem:[%s3462_s18 + $0x100] sm:$0xf]  ;;  %v2849_v45 = vld [vmem:[%s3462_s18 + $0x104] sm:$0xf] }
 0x12c   : > { %v2150_v46 = vpack.c.bf16 %v1616_v44, %v1278_v40  ;;  %v2850_v44 = vld [vmem:[%s3462_s18 + $0x104] sm:$0xf0] }
 0x12d   : > { %v2554_v48 = vor.u32 %v2850_v44, %v2553_v43 }
 0x12e   : > { %2214 = vst [vmem:[%s3580_s12 + $0x40] sm:$0xff] %v2150_v46  ;;  %v2555_v46 = vld [vmem:[%s3462_s18 + $0x108] sm:$0xf0] }
 0x130   : > { %v1448_v51 = vpop.f32.mrf.mxu2  ;;  %v1113_v54 = vpop.f32.mrf.mxu0 }
 0x131   : > { %v1617_v53 = vpop.f32.mrf.mxu3  ;;  %v1282_v58 = vpop.f32.mrf.mxu1 }
 0x132   : > { %v1618_v57 = vadd.f32 %v1617_v53, %v1448_v51  ;;  %v1283_v60 = vadd.f32 %v1282_v58, %v1113_v54  ;;  %v2558_v51 = vor.u32 %v2849_v45, %v2555_v46 }
 0x133   : > { %1152 = vmatmul.bf16.gmra.mxu0 %v2530_v52 }
 0x134   : > { %v2151_v59 = vpack.c.bf16 %v1618_v57, %v1280_v56  ;;  %1321 = vmatmul.bf16.gmra.mxu1 %v2534_v55 }
 0x135   : > { %1490 = vmatmul.bf16.gmra.mxu2 %v2530_v52 }
 0x136   : > { %2215 = vst [vmem:[%s3580_s12 + $0x48] sm:$0xff] %v2151_v59  ;;  %1659 = vmatmul.bf16.gmra.mxu3 %v2534_v55 }
 0x138   : > { %v1451_v61 = vpop.f32.mrf.mxu2  ;;  %v1115_v63 = vpop.f32.mrf.mxu0 }
 0x139   : > { %v1620_v62 = vpop.f32.mrf.mxu3  ;;  %v1284_v1 = vpop.f32.mrf.mxu1 }
 0x13a   : > { %v1621_v0 = vadd.f32 %v1620_v62, %v1451_v61  ;;  %v1285_v12 = vadd.f32 %v1284_v1, %v1115_v63  ;;  %v2561_v63 = vld [vmem:[%s3462_s18 + $0x110] sm:$0xf]  ;;  %v2851_v1 = vld [vmem:[%s3462_s18 + $0x114] sm:$0xf] }
 0x13c   : > { %v2152_v2 = vpack.c.bf16 %v1621_v0, %v1283_v60  ;;  %v2852_v0 = vld [vmem:[%s3462_s18 + $0x114] sm:$0xf0] }
 0x13d   : > { %v2562_v4 = vor.u32 %v2852_v0, %v2561_v63 }
 0x13e   : > { %2216 = vst [vmem:[%s3580_s12 + $0x50] sm:$0xff] %v2152_v2  ;;  %v2563_v2 = vld [vmem:[%s3462_s18 + $0x118] sm:$0xf0] }
 0x140   : > { %v1453_v7 = vpop.f32.mrf.mxu2  ;;  %v1118_v10 = vpop.f32.mrf.mxu0 }
 0x141   : > { %v1622_v9 = vpop.f32.mrf.mxu3  ;;  %v1287_v14 = vpop.f32.mrf.mxu1 }
 0x142   : > { %v1623_v13 = vadd.f32 %v1622_v9, %v1453_v7  ;;  %v1288_v16 = vadd.f32 %v1287_v14, %v1118_v10  ;;  %v2566_v7 = vor.u32 %v2851_v1, %v2563_v2 }
 0x143   : > { %1157 = vmatmul.bf16.gmra.mxu0 %v2538_v8 }
 0x144   : > { %v2153_v15 = vpack.c.bf16 %v1623_v13, %v1285_v12  ;;  %1326 = vmatmul.bf16.gmra.mxu1 %v2542_v11 }
 0x145   : > { %1495 = vmatmul.bf16.gmra.mxu2 %v2538_v8 }
 0x146   : > { %2217 = vst [vmem:[%s3580_s12 + $0x58] sm:$0xff] %v2153_v15  ;;  %1664 = vmatmul.bf16.gmra.mxu3 %v2542_v11 }
 0x148   : > { %v1456_v17 = vpop.f32.mrf.mxu2  ;;  %v1120_v19 = vpop.f32.mrf.mxu0 }
 0x149   : > { %v1625_v18 = vpop.f32.mrf.mxu3  ;;  %v1289_v21 = vpop.f32.mrf.mxu1 }
 0x14a   : > { %v1626_v20 = vadd.f32 %v1625_v18, %v1456_v17  ;;  %v1290_v32 = vadd.f32 %v1289_v21, %v1120_v19  ;;  %v2569_v19 = vld [vmem:[%s3462_s18 + $0x120] sm:$0xf]  ;;  %v2853_v21 = vld [vmem:[%s3462_s18 + $0x124] sm:$0xf] }
 0x14c   : > { %v2154_v22 = vpack.c.bf16 %v1626_v20, %v1288_v16  ;;  %v2854_v20 = vld [vmem:[%s3462_s18 + $0x124] sm:$0xf0] }
 0x14d   : > { %v2570_v24 = vor.u32 %v2854_v20, %v2569_v19 }
 0x14e   : > { %2218 = vst [vmem:[%s3580_s12 + $0x60] sm:$0xff] %v2154_v22  ;;  %v2571_v22 = vld [vmem:[%s3462_s18 + $0x128] sm:$0xf0] }
 0x150   : > { %v1458_v27 = vpop.f32.mrf.mxu2  ;;  %v1123_v30 = vpop.f32.mrf.mxu0 }
 0x151   : > { %v1627_v29 = vpop.f32.mrf.mxu3  ;;  %v1292_v34 = vpop.f32.mrf.mxu1 }
 0x152   : > { %v1628_v33 = vadd.f32 %v1627_v29, %v1458_v27  ;;  %v1293_v36 = vadd.f32 %v1292_v34, %v1123_v30  ;;  %v2574_v27 = vor.u32 %v2853_v21, %v2571_v22 }
 0x153   : > { %1162 = vmatmul.bf16.gmra.mxu0 %v2546_v28 }
 0x154   : > { %v2155_v35 = vpack.c.bf16 %v1628_v33, %v1290_v32  ;;  %1331 = vmatmul.bf16.gmra.mxu1 %v2550_v31 }
 0x155   : > { %1500 = vmatmul.bf16.gmra.mxu2 %v2546_v28 }
 0x156   : > { %2219 = vst [vmem:[%s3580_s12 + $0x68] sm:$0xff] %v2155_v35  ;;  %1669 = vmatmul.bf16.gmra.mxu3 %v2550_v31 }
 0x158   : > { %v1461_v37 = vpop.f32.mrf.mxu2  ;;  %v1125_v39 = vpop.f32.mrf.mxu0 }
 0x159   : > { %v1630_v38 = vpop.f32.mrf.mxu3  ;;  %v1294_v41 = vpop.f32.mrf.mxu1 }
 0x15a   : > { %v1631_v40 = vadd.f32 %v1630_v38, %v1461_v37  ;;  %v1295_v52 = vadd.f32 %v1294_v41, %v1125_v39  ;;  %v2577_v39 = vld [vmem:[%s3462_s18 + $0x130] sm:$0xf]  ;;  %v2855_v41 = vld [vmem:[%s3462_s18 + $0x134] sm:$0xf] }
 0x15c   : > { %v2156_v42 = vpack.c.bf16 %v1631_v40, %v1293_v36  ;;  %v2856_v40 = vld [vmem:[%s3462_s18 + $0x134] sm:$0xf0] }
 0x15d   : > { %v2578_v44 = vor.u32 %v2856_v40, %v2577_v39 }
 0x15e   : > { %2220 = vst [vmem:[%s3580_s12 + $0x70] sm:$0xff] %v2156_v42  ;;  %v2579_v42 = vld [vmem:[%s3462_s18 + $0x138] sm:$0xf0] }
 0x160   : > { %v1463_v47 = vpop.f32.mrf.mxu2  ;;  %v1128_v50 = vpop.f32.mrf.mxu0 }
 0x161   : > { %v1632_v49 = vpop.f32.mrf.mxu3  ;;  %v1297_v54 = vpop.f32.mrf.mxu1 }
 0x162   : > { %v1633_v53 = vadd.f32 %v1632_v49, %v1463_v47  ;;  %v1298_v56 = vadd.f32 %v1297_v54, %v1128_v50  ;;  %v2582_v47 = vor.u32 %v2855_v41, %v2579_v42 }
 0x163   : > { %1167 = vmatmul.bf16.gmra.mxu0 %v2554_v48 }
 0x164   : > { %v2157_v55 = vpack.c.bf16 %v1633_v53, %v1295_v52  ;;  %1336 = vmatmul.bf16.gmra.mxu1 %v2558_v51 }
 0x165   : > { %1505 = vmatmul.bf16.gmra.mxu2 %v2554_v48 }
 0x166   : > { %2221 = vst [vmem:[%s3580_s12 + $0x78] sm:$0xff] %v2157_v55  ;;  %1674 = vmatmul.bf16.gmra.mxu3 %v2558_v51 }
 0x168   : > { %v1466_v57 = vpop.f32.mrf.mxu2  ;;  %v1130_v59 = vpop.f32.mrf.mxu0 }
 0x169   : > { %v1635_v58 = vpop.f32.mrf.mxu3  ;;  %v1299_v61 = vpop.f32.mrf.mxu1 }
 0x16a   : > { %v1636_v60 = vadd.f32 %v1635_v58, %v1466_v57  ;;  %v1300_v8 = vadd.f32 %v1299_v61, %v1130_v59  ;;  %v2585_v59 = vld [vmem:[%s3462_s18 + $0x140] sm:$0xf]  ;;  %v2857_v61 = vld [vmem:[%s3462_s18 + $0x144] sm:$0xf] }
 0x16c   : > { %v2158_v62 = vpack.c.bf16 %v1636_v60, %v1298_v56  ;;  %v2858_v60 = vld [vmem:[%s3462_s18 + $0x144] sm:$0xf0] }
 0x16d   : > { %v2586_v0 = vor.u32 %v2858_v60, %v2585_v59 }
 0x16e   : > { %2222 = vst [vmem:[%s3580_s12 + $0x80] sm:$0xff] %v2158_v62  ;;  %v2587_v62 = vld [vmem:[%s3462_s18 + $0x148] sm:$0xf0] }
 0x170   : > { %v1468_v3 = vpop.f32.mrf.mxu2  ;;  %v1133_v6 = vpop.f32.mrf.mxu0 }
 0x171   : > { %v1637_v5 = vpop.f32.mrf.mxu3  ;;  %v1302_v10 = vpop.f32.mrf.mxu1 }
 0x172   : > { %v1638_v9 = vadd.f32 %v1637_v5, %v1468_v3  ;;  %v1303_v12 = vadd.f32 %v1302_v10, %v1133_v6  ;;  %v2590_v3 = vor.u32 %v2857_v61, %v2587_v62 }
 0x173   : > { %1172 = vmatmul.bf16.gmra.mxu0 %v2562_v4 }
 0x174   : > { %v2159_v11 = vpack.c.bf16 %v1638_v9, %v1300_v8  ;;  %1341 = vmatmul.bf16.gmra.mxu1 %v2566_v7 }
 0x175   : > { %1510 = vmatmul.bf16.gmra.mxu2 %v2562_v4 }
 0x176   : > { %2223 = vst [vmem:[%s3580_s12 + $0x88] sm:$0xff] %v2159_v11  ;;  %1679 = vmatmul.bf16.gmra.mxu3 %v2566_v7 }
 0x178   : > { %v1471_v13 = vpop.f32.mrf.mxu2  ;;  %v1135_v15 = vpop.f32.mrf.mxu0 }
 0x179   : > { %v1640_v14 = vpop.f32.mrf.mxu3  ;;  %v1304_v17 = vpop.f32.mrf.mxu1 }
 0x17a   : > { %v1641_v16 = vadd.f32 %v1640_v14, %v1471_v13  ;;  %v1305_v28 = vadd.f32 %v1304_v17, %v1135_v15  ;;  %v2593_v15 = vld [vmem:[%s3462_s18 + $0x150] sm:$0xf]  ;;  %v2859_v17 = vld [vmem:[%s3462_s18 + $0x154] sm:$0xf] }
 0x17c   : > { %v2160_v18 = vpack.c.bf16 %v1641_v16, %v1303_v12  ;;  %v2860_v16 = vld [vmem:[%s3462_s18 + $0x154] sm:$0xf0] }
 0x17d   : > { %v2594_v20 = vor.u32 %v2860_v16, %v2593_v15 }
 0x17e   : > { %2224 = vst [vmem:[%s3580_s12 + $0x90] sm:$0xff] %v2160_v18  ;;  %v2595_v18 = vld [vmem:[%s3462_s18 + $0x158] sm:$0xf0] }
 0x180   : > { %v1473_v23 = vpop.f32.mrf.mxu2  ;;  %v1138_v26 = vpop.f32.mrf.mxu0 }
 0x181   : > { %v1642_v25 = vpop.f32.mrf.mxu3  ;;  %v1307_v30 = vpop.f32.mrf.mxu1 }
 0x182   : > { %v1643_v29 = vadd.f32 %v1642_v25, %v1473_v23  ;;  %v1308_v32 = vadd.f32 %v1307_v30, %v1138_v26  ;;  %v2598_v23 = vor.u32 %v2859_v17, %v2595_v18 }
 0x183   : > { %1177 = vmatmul.bf16.gmra.mxu0 %v2570_v24 }
 0x184   : > { %v2161_v31 = vpack.c.bf16 %v1643_v29, %v1305_v28  ;;  %1346 = vmatmul.bf16.gmra.mxu1 %v2574_v27 }
 0x185   : > { %1515 = vmatmul.bf16.gmra.mxu2 %v2570_v24 }
 0x186   : > { %2225 = vst [vmem:[%s3580_s12 + $0x98] sm:$0xff] %v2161_v31  ;;  %1684 = vmatmul.bf16.gmra.mxu3 %v2574_v27 }
 0x188   : > { %v1476_v33 = vpop.f32.mrf.mxu2  ;;  %v1140_v35 = vpop.f32.mrf.mxu0 }
 0x189   : > { %v1645_v34 = vpop.f32.mrf.mxu3  ;;  %v1309_v37 = vpop.f32.mrf.mxu1 }
 0x18a   : > { %v1646_v36 = vadd.f32 %v1645_v34, %v1476_v33  ;;  %v1310_v48 = vadd.f32 %v1309_v37, %v1140_v35  ;;  %v2601_v35 = vld [vmem:[%s3462_s18 + $0x160] sm:$0xf]  ;;  %v2861_v37 = vld [vmem:[%s3462_s18 + $0x164] sm:$0xf] }
 0x18c   : > { %v2162_v38 = vpack.c.bf16 %v1646_v36, %v1308_v32  ;;  %v2862_v36 = vld [vmem:[%s3462_s18 + $0x164] sm:$0xf0] }
 0x18d   : > { %v2602_v40 = vor.u32 %v2862_v36, %v2601_v35 }
 0x18e   : > { %2226 = vst [vmem:[%s3580_s12 + $0xa0] sm:$0xff] %v2162_v38  ;;  %v2603_v38 = vld [vmem:[%s3462_s18 + $0x168] sm:$0xf0] }
 0x190   : > { %v1478_v43 = vpop.f32.mrf.mxu2  ;;  %v1143_v46 = vpop.f32.mrf.mxu0 }
 0x191   : > { %v1647_v45 = vpop.f32.mrf.mxu3  ;;  %v1312_v50 = vpop.f32.mrf.mxu1 }
 0x192   : > { %v1648_v49 = vadd.f32 %v1647_v45, %v1478_v43  ;;  %v1313_v52 = vadd.f32 %v1312_v50, %v1143_v46  ;;  %v2606_v43 = vor.u32 %v2861_v37, %v2603_v38 }
 0x193   : > { %1182 = vmatmul.bf16.gmra.mxu0 %v2578_v44 }
 0x194   : > { %v2163_v51 = vpack.c.bf16 %v1648_v49, %v1310_v48  ;;  %1351 = vmatmul.bf16.gmra.mxu1 %v2582_v47 }
 0x195   : > { %1520 = vmatmul.bf16.gmra.mxu2 %v2578_v44 }
 0x196   : > { %2227 = vst [vmem:[%s3580_s12 + $0xa8] sm:$0xff] %v2163_v51  ;;  %1689 = vmatmul.bf16.gmra.mxu3 %v2582_v47 }
 0x198   : > { %v1481_v53 = vpop.f32.mrf.mxu2  ;;  %v1145_v55 = vpop.f32.mrf.mxu0 }
 0x199   : > { %v1650_v54 = vpop.f32.mrf.mxu3  ;;  %v1314_v57 = vpop.f32.mrf.mxu1 }
 0x19a   : > { %v1651_v56 = vadd.f32 %v1650_v54, %v1481_v53  ;;  %v1315_v4 = vadd.f32 %v1314_v57, %v1145_v55  ;;  %v2609_v55 = vld [vmem:[%s3462_s18 + $0x170] sm:$0xf]  ;;  %v2863_v57 = vld [vmem:[%s3462_s18 + $0x174] sm:$0xf] }
 0x19c   : > { %v2164_v58 = vpack.c.bf16 %v1651_v56, %v1313_v52  ;;  %v2864_v56 = vld [vmem:[%s3462_s18 + $0x174] sm:$0xf0] }
 0x19d   : > { %v2610_v60 = vor.u32 %v2864_v56, %v2609_v55 }
 0x19e   : > { %2228 = vst [vmem:[%s3580_s12 + $0xb0] sm:$0xff] %v2164_v58  ;;  %v2611_v58 = vld [vmem:[%s3462_s18 + $0x178] sm:$0xf0] }
 0x1a0   : > { %v1483_v63 = vpop.f32.mrf.mxu2  ;;  %v1148_v2 = vpop.f32.mrf.mxu0 }
 0x1a1   : > { %v1652_v1 = vpop.f32.mrf.mxu3  ;;  %v1317_v6 = vpop.f32.mrf.mxu1 }
 0x1a2   : > { %v1653_v5 = vadd.f32 %v1652_v1, %v1483_v63  ;;  %v1318_v8 = vadd.f32 %v1317_v6, %v1148_v2  ;;  %v2614_v63 = vor.u32 %v2863_v57, %v2611_v58 }
 0x1a3   : > { %1187 = vmatmul.bf16.gmra.mxu0 %v2586_v0 }
 0x1a4   : > { %v2165_v7 = vpack.c.bf16 %v1653_v5, %v1315_v4  ;;  %1356 = vmatmul.bf16.gmra.mxu1 %v2590_v3 }
 0x1a5   : > { %1525 = vmatmul.bf16.gmra.mxu2 %v2586_v0 }
 0x1a6   : > { %2229 = vst [vmem:[%s3580_s12 + $0xb8] sm:$0xff] %v2165_v7  ;;  %1694 = vmatmul.bf16.gmra.mxu3 %v2590_v3 }
 0x1a8   : > { %v1486_v9 = vpop.f32.mrf.mxu2  ;;  %v1150_v11 = vpop.f32.mrf.mxu0 }
 0x1a9   : > { %v1655_v10 = vpop.f32.mrf.mxu3  ;;  %v1319_v13 = vpop.f32.mrf.mxu1 }
 0x1aa   : > { %v1656_v12 = vadd.f32 %v1655_v10, %v1486_v9  ;;  %v1320_v24 = vadd.f32 %v1319_v13, %v1150_v11  ;;  %v2617_v11 = vld [vmem:[%s3462_s18 + $0x180] sm:$0xf]  ;;  %v2865_v13 = vld [vmem:[%s3462_s18 + $0x184] sm:$0xf] }
 0x1ac   : > { %v2166_v14 = vpack.c.bf16 %v1656_v12, %v1318_v8  ;;  %v2866_v12 = vld [vmem:[%s3462_s18 + $0x184] sm:$0xf0] }
 0x1ad   : > { %v2618_v16 = vor.u32 %v2866_v12, %v2617_v11 }
 0x1ae   : > { %2230 = vst [vmem:[%s3580_s12 + $0xc0] sm:$0xff] %v2166_v14  ;;  %v2619_v14 = vld [vmem:[%s3462_s18 + $0x188] sm:$0xf0] }
 0x1b0   : > { %v1488_v19 = vpop.f32.mrf.mxu2  ;;  %v1153_v22 = vpop.f32.mrf.mxu0 }
 0x1b1   : > { %v1657_v21 = vpop.f32.mrf.mxu3  ;;  %v1322_v26 = vpop.f32.mrf.mxu1 }
 0x1b2   : > { %v1658_v25 = vadd.f32 %v1657_v21, %v1488_v19  ;;  %v1323_v28 = vadd.f32 %v1322_v26, %v1153_v22  ;;  %v2622_v19 = vor.u32 %v2865_v13, %v2619_v14 }
 0x1b3   : > { %1192 = vmatmul.bf16.gmra.mxu0 %v2594_v20 }
 0x1b4   : > { %v2167_v27 = vpack.c.bf16 %v1658_v25, %v1320_v24  ;;  %1361 = vmatmul.bf16.gmra.mxu1 %v2598_v23 }
 0x1b5   : > { %1530 = vmatmul.bf16.gmra.mxu2 %v2594_v20 }
 0x1b6   : > { %2231 = vst [vmem:[%s3580_s12 + $0xc8] sm:$0xff] %v2167_v27  ;;  %1699 = vmatmul.bf16.gmra.mxu3 %v2598_v23 }
 0x1b8   : > { %v1491_v29 = vpop.f32.mrf.mxu2  ;;  %v1155_v31 = vpop.f32.mrf.mxu0 }
 0x1b9   : > { %v1660_v30 = vpop.f32.mrf.mxu3  ;;  %v1324_v33 = vpop.f32.mrf.mxu1 }
 0x1ba   : > { %v1661_v32 = vadd.f32 %v1660_v30, %v1491_v29  ;;  %v1325_v44 = vadd.f32 %v1324_v33, %v1155_v31  ;;  %v2625_v31 = vld [vmem:[%s3462_s18 + $0x190] sm:$0xf]  ;;  %v2867_v33 = vld [vmem:[%s3462_s18 + $0x194] sm:$0xf] }
 0x1bc   : > { %v2168_v34 = vpack.c.bf16 %v1661_v32, %v1323_v28  ;;  %v2868_v32 = vld [vmem:[%s3462_s18 + $0x194] sm:$0xf0] }
 0x1bd   : > { %v2626_v36 = vor.u32 %v2868_v32, %v2625_v31 }
 0x1be   : > { %2232 = vst [vmem:[%s3580_s12 + $0xd0] sm:$0xff] %v2168_v34  ;;  %v2627_v34 = vld [vmem:[%s3462_s18 + $0x198] sm:$0xf0] }
 0x1c0   : > { %v1493_v39 = vpop.f32.mrf.mxu2  ;;  %v1158_v42 = vpop.f32.mrf.mxu0 }
 0x1c1   : > { %v1662_v41 = vpop.f32.mrf.mxu3  ;;  %v1327_v46 = vpop.f32.mrf.mxu1 }
 0x1c2   : > { %v1663_v45 = vadd.f32 %v1662_v41, %v1493_v39  ;;  %v1328_v48 = vadd.f32 %v1327_v46, %v1158_v42  ;;  %v2630_v39 = vor.u32 %v2867_v33, %v2627_v34 }
 0x1c3   : > { %1197 = vmatmul.bf16.gmra.mxu0 %v2602_v40 }
 0x1c4   : > { %v2169_v47 = vpack.c.bf16 %v1663_v45, %v1325_v44  ;;  %1366 = vmatmul.bf16.gmra.mxu1 %v2606_v43 }
 0x1c5   : > { %1535 = vmatmul.bf16.gmra.mxu2 %v2602_v40 }
 0x1c6   : > { %2233 = vst [vmem:[%s3580_s12 + $0xd8] sm:$0xff] %v2169_v47  ;;  %1704 = vmatmul.bf16.gmra.mxu3 %v2606_v43 }
 0x1c8   : > { %v1496_v49 = vpop.f32.mrf.mxu2  ;;  %v1160_v51 = vpop.f32.mrf.mxu0 }
 0x1c9   : > { %v1665_v50 = vpop.f32.mrf.mxu3  ;;  %v1329_v53 = vpop.f32.mrf.mxu1 }
 0x1ca   : > { %v1666_v52 = vadd.f32 %v1665_v50, %v1496_v49  ;;  %v1330_v0 = vadd.f32 %v1329_v53, %v1160_v51  ;;  %v2633_v51 = vld [vmem:[%s3462_s18 + $0x1a0] sm:$0xf]  ;;  %v2869_v53 = vld [vmem:[%s3462_s18 + $0x1a4] sm:$0xf] }
 0x1cc   : > { %v2170_v54 = vpack.c.bf16 %v1666_v52, %v1328_v48  ;;  %v2870_v52 = vld [vmem:[%s3462_s18 + $0x1a4] sm:$0xf0] }
 0x1cd   : > { %v2634_v56 = vor.u32 %v2870_v52, %v2633_v51 }
 0x1ce   : > { %2234 = vst [vmem:[%s3580_s12 + $0xe0] sm:$0xff] %v2170_v54  ;;  %v2635_v54 = vld [vmem:[%s3462_s18 + $0x1a8] sm:$0xf0] }
 0x1d0   : > { %v1498_v59 = vpop.f32.mrf.mxu2  ;;  %v1163_v62 = vpop.f32.mrf.mxu0 }
 0x1d1   : > { %v1667_v61 = vpop.f32.mrf.mxu3  ;;  %v1332_v2 = vpop.f32.mrf.mxu1 }
 0x1d2   : > { %v1668_v1 = vadd.f32 %v1667_v61, %v1498_v59  ;;  %v1333_v4 = vadd.f32 %v1332_v2, %v1163_v62  ;;  %v2638_v59 = vor.u32 %v2869_v53, %v2635_v54 }
 0x1d3   : > { %1202 = vmatmul.bf16.gmra.mxu0 %v2610_v60 }
 0x1d4   : > { %v2171_v3 = vpack.c.bf16 %v1668_v1, %v1330_v0  ;;  %1371 = vmatmul.bf16.gmra.mxu1 %v2614_v63 }
 0x1d5   : > { %1540 = vmatmul.bf16.gmra.mxu2 %v2610_v60 }
 0x1d6   : > { %2235 = vst [vmem:[%s3580_s12 + $0xe8] sm:$0xff] %v2171_v3  ;;  %1709 = vmatmul.bf16.gmra.mxu3 %v2614_v63 }
 0x1d8   : > { %v1501_v5 = vpop.f32.mrf.mxu2  ;;  %v1165_v7 = vpop.f32.mrf.mxu0 }
 0x1d9   : > { %v1670_v6 = vpop.f32.mrf.mxu3  ;;  %v1334_v9 = vpop.f32.mrf.mxu1 }
 0x1da   : > { %v1671_v8 = vadd.f32 %v1670_v6, %v1501_v5  ;;  %v1335_v20 = vadd.f32 %v1334_v9, %v1165_v7  ;;  %v2641_v7 = vld [vmem:[%s3462_s18 + $0x1b0] sm:$0xf]  ;;  %v2871_v9 = vld [vmem:[%s3462_s18 + $0x1b4] sm:$0xf] }
 0x1dc   : > { %v2172_v10 = vpack.c.bf16 %v1671_v8, %v1333_v4  ;;  %v2872_v8 = vld [vmem:[%s3462_s18 + $0x1b4] sm:$0xf0] }
 0x1dd   : > { %v2642_v12 = vor.u32 %v2872_v8, %v2641_v7 }
 0x1de   : > { %2236 = vst [vmem:[%s3580_s12 + $0xf0] sm:$0xff] %v2172_v10  ;;  %v2643_v10 = vld [vmem:[%s3462_s18 + $0x1b8] sm:$0xf0] }
 0x1e0   : > { %v1503_v15 = vpop.f32.mrf.mxu2  ;;  %v1168_v18 = vpop.f32.mrf.mxu0 }
 0x1e1   : > { %v1672_v17 = vpop.f32.mrf.mxu3  ;;  %v1337_v22 = vpop.f32.mrf.mxu1 }
 0x1e2   : > { %v1673_v21 = vadd.f32 %v1672_v17, %v1503_v15  ;;  %v1338_v24 = vadd.f32 %v1337_v22, %v1168_v18  ;;  %v2646_v15 = vor.u32 %v2871_v9, %v2643_v10 }
 0x1e3   : > { %1207 = vmatmul.bf16.gmra.mxu0 %v2618_v16 }
 0x1e4   : > { %v2173_v23 = vpack.c.bf16 %v1673_v21, %v1335_v20  ;;  %1376 = vmatmul.bf16.gmra.mxu1 %v2622_v19 }
 0x1e5   : > { %1545 = vmatmul.bf16.gmra.mxu2 %v2618_v16 }
 0x1e6   : > { %2237 = vst [vmem:[%s3580_s12 + $0xf8] sm:$0xff] %v2173_v23  ;;  %1714 = vmatmul.bf16.gmra.mxu3 %v2622_v19 }
 0x1e8   : > { %v1506_v25 = vpop.f32.mrf.mxu2  ;;  %v1170_v27 = vpop.f32.mrf.mxu0 }
 0x1e9   : > { %v1675_v26 = vpop.f32.mrf.mxu3  ;;  %v1339_v29 = vpop.f32.mrf.mxu1 }
 0x1ea   : > { %v1676_v28 = vadd.f32 %v1675_v26, %v1506_v25  ;;  %v1340_v40 = vadd.f32 %v1339_v29, %v1170_v27  ;;  %v2649_v27 = vld [vmem:[%s3462_s18 + $0x1c0] sm:$0xf]  ;;  %v2873_v29 = vld [vmem:[%s3462_s18 + $0x1c4] sm:$0xf] }
 0x1ec   : > { %v2174_v30 = vpack.c.bf16 %v1676_v28, %v1338_v24  ;;  %v2874_v28 = vld [vmem:[%s3462_s18 + $0x1c4] sm:$0xf0] }
 0x1ed   : > { %v2650_v32 = vor.u32 %v2874_v28, %v2649_v27 }
 0x1ee   : > { %2238 = vst [vmem:[%s3580_s12 + $0x100] sm:$0xff] %v2174_v30  ;;  %v2651_v30 = vld [vmem:[%s3462_s18 + $0x1c8] sm:$0xf0] }
 0x1f0   : > { %v1508_v35 = vpop.f32.mrf.mxu2  ;;  %v1173_v38 = vpop.f32.mrf.mxu0 }
 0x1f1   : > { %v1677_v37 = vpop.f32.mrf.mxu3  ;;  %v1342_v42 = vpop.f32.mrf.mxu1 }
 0x1f2   : > { %v1678_v41 = vadd.f32 %v1677_v37, %v1508_v35  ;;  %v1343_v44 = vadd.f32 %v1342_v42, %v1173_v38  ;;  %v2654_v35 = vor.u32 %v2873_v29, %v2651_v30 }
 0x1f3   : > { %1212 = vmatmul.bf16.gmra.mxu0 %v2626_v36 }
 0x1f4   : > { %v2175_v43 = vpack.c.bf16 %v1678_v41, %v1340_v40  ;;  %1381 = vmatmul.bf16.gmra.mxu1 %v2630_v39 }
 0x1f5   : > { %1550 = vmatmul.bf16.gmra.mxu2 %v2626_v36 }
 0x1f6   : > { %2239 = vst [vmem:[%s3580_s12 + $0x108] sm:$0xff] %v2175_v43  ;;  %1719 = vmatmul.bf16.gmra.mxu3 %v2630_v39 }
 0x1f8   : > { %v1511_v45 = vpop.f32.mrf.mxu2  ;;  %v1175_v47 = vpop.f32.mrf.mxu0 }
 0x1f9   : > { %v1680_v46 = vpop.f32.mrf.mxu3  ;;  %v1344_v49 = vpop.f32.mrf.mxu1 }
 0x1fa   : > { %v1681_v48 = vadd.f32 %v1680_v46, %v1511_v45  ;;  %v1345_v60 = vadd.f32 %v1344_v49, %v1175_v47  ;;  %v2657_v47 = vld [vmem:[%s3462_s18 + $0x1d0] sm:$0xf]  ;;  %v2875_v49 = vld [vmem:[%s3462_s18 + $0x1d4] sm:$0xf] }
 0x1fc   : > { %v2176_v50 = vpack.c.bf16 %v1681_v48, %v1343_v44  ;;  %v2876_v48 = vld [vmem:[%s3462_s18 + $0x1d4] sm:$0xf0] }
 0x1fd   : > { %v2658_v52 = vor.u32 %v2876_v48, %v2657_v47 }
 0x1fe   : > { %2240 = vst [vmem:[%s3580_s12 + $0x110] sm:$0xff] %v2176_v50  ;;  %v2659_v50 = vld [vmem:[%s3462_s18 + $0x1d8] sm:$0xf0] }
 0x200   : > { %v1513_v55 = vpop.f32.mrf.mxu2  ;;  %v1178_v58 = vpop.f32.mrf.mxu0 }
 0x201   : > { %v1682_v57 = vpop.f32.mrf.mxu3  ;;  %v1347_v62 = vpop.f32.mrf.mxu1 }
 0x202   : > { %v1683_v61 = vadd.f32 %v1682_v57, %v1513_v55  ;;  %v1348_v0 = vadd.f32 %v1347_v62, %v1178_v58  ;;  %v2662_v55 = vor.u32 %v2875_v49, %v2659_v50 }
 0x203   : > { %1217 = vmatmul.bf16.gmra.mxu0 %v2634_v56 }
 0x204   : > { %v2177_v63 = vpack.c.bf16 %v1683_v61, %v1345_v60  ;;  %1386 = vmatmul.bf16.gmra.mxu1 %v2638_v59 }
 0x205   : > { %1555 = vmatmul.bf16.gmra.mxu2 %v2634_v56 }
 0x206   : > { %2241 = vst [vmem:[%s3580_s12 + $0x118] sm:$0xff] %v2177_v63  ;;  %1724 = vmatmul.bf16.gmra.mxu3 %v2638_v59 }
 0x208   : > { %v1516_v1 = vpop.f32.mrf.mxu2  ;;  %v1180_v3 = vpop.f32.mrf.mxu0 }
 0x209   : > { %v1685_v2 = vpop.f32.mrf.mxu3  ;;  %v1349_v5 = vpop.f32.mrf.mxu1 }
 0x20a   : > { %v1686_v4 = vadd.f32 %v1685_v2, %v1516_v1  ;;  %v1350_v16 = vadd.f32 %v1349_v5, %v1180_v3  ;;  %v2665_v3 = vld [vmem:[%s3462_s18 + $0x1e0] sm:$0xf]  ;;  %v2877_v5 = vld [vmem:[%s3462_s18 + $0x1e4] sm:$0xf] }
 0x20c   : > { %v2178_v6 = vpack.c.bf16 %v1686_v4, %v1348_v0  ;;  %v2878_v4 = vld [vmem:[%s3462_s18 + $0x1e4] sm:$0xf0] }
 0x20d   : > { %v2666_v8 = vor.u32 %v2878_v4, %v2665_v3 }
 0x20e   : > { %2242 = vst [vmem:[%s3580_s12 + $0x120] sm:$0xff] %v2178_v6  ;;  %v2667_v6 = vld [vmem:[%s3462_s18 + $0x1e8] sm:$0xf0] }
 0x210   : > { %v1518_v11 = vpop.f32.mrf.mxu2  ;;  %v1183_v14 = vpop.f32.mrf.mxu0 }
 0x211   : > { %v1687_v13 = vpop.f32.mrf.mxu3  ;;  %v1352_v18 = vpop.f32.mrf.mxu1 }
 0x212   : > { %v1688_v17 = vadd.f32 %v1687_v13, %v1518_v11  ;;  %v1353_v20 = vadd.f32 %v1352_v18, %v1183_v14  ;;  %v2670_v11 = vor.u32 %v2877_v5, %v2667_v6 }
 0x213   : > { %1222 = vmatmul.bf16.gmra.mxu0 %v2642_v12 }
 0x214   : > { %v2179_v19 = vpack.c.bf16 %v1688_v17, %v1350_v16  ;;  %1391 = vmatmul.bf16.gmra.mxu1 %v2646_v15 }
 0x215   : > { %1560 = vmatmul.bf16.gmra.mxu2 %v2642_v12 }
 0x216   : > { %2243 = vst [vmem:[%s3580_s12 + $0x128] sm:$0xff] %v2179_v19  ;;  %1729 = vmatmul.bf16.gmra.mxu3 %v2646_v15 }
 0x218   : > { %v1521_v21 = vpop.f32.mrf.mxu2  ;;  %v1185_v23 = vpop.f32.mrf.mxu0 }
 0x219   : > { %v1690_v22 = vpop.f32.mrf.mxu3  ;;  %v1354_v25 = vpop.f32.mrf.mxu1 }
 0x21a   : > { %v1691_v24 = vadd.f32 %v1690_v22, %v1521_v21  ;;  %v1355_v36 = vadd.f32 %v1354_v25, %v1185_v23  ;;  %v2673_v23 = vld [vmem:[%s3462_s18 + $0x1f0] sm:$0xf]  ;;  %v2879_v25 = vld [vmem:[%s3462_s18 + $0x1f4] sm:$0xf] }
 0x21c   : > { %v2180_v26 = vpack.c.bf16 %v1691_v24, %v1353_v20  ;;  %v2880_v24 = vld [vmem:[%s3462_s18 + $0x1f4] sm:$0xf0] }
 0x21d   : > { %v2674_v28 = vor.u32 %v2880_v24, %v2673_v23 }
 0x21e   : > { %2244 = vst [vmem:[%s3580_s12 + $0x130] sm:$0xff] %v2180_v26  ;;  %v2675_v26 = vld [vmem:[%s3462_s18 + $0x1f8] sm:$0xf0]  ;;  %s2286_s18 = sshll.u32 %s3580_s12, 4  ;;  %s2287_s18 = int_to_ptr.vmem [resolvable:$true] %s2286_s18 }
 0x220   : > { %v1523_v31 = vpop.f32.mrf.mxu2  ;;  %v1188_v34 = vpop.f32.mrf.mxu0 }
 0x221   : > { %v1692_v33 = vpop.f32.mrf.mxu3  ;;  %v1357_v38 = vpop.f32.mrf.mxu1 }
 0x222   : > { %v1693_v37 = vadd.f32 %v1692_v33, %v1523_v31  ;;  %v1358_v40 = vadd.f32 %v1357_v38, %v1188_v34  ;;  %v2678_v31 = vor.u32 %v2879_v25, %v2675_v26 }
 0x223   : > { %1227 = vmatmul.bf16.gmra.mxu0 %v2650_v32 }
 0x224   : > { %v2181_v39 = vpack.c.bf16 %v1693_v37, %v1355_v36  ;;  %1396 = vmatmul.bf16.gmra.mxu1 %v2654_v35 }
 0x225   : > { %1565 = vmatmul.bf16.gmra.mxu2 %v2650_v32 }
 0x226   : > { %2245 = vst [vmem:[%s3580_s12 + $0x138] sm:$0xff] %v2181_v39  ;;  %1734 = vmatmul.bf16.gmra.mxu3 %v2654_v35 }
 0x228   : > { %v1526_v41 = vpop.f32.mrf.mxu2  ;;  %v1190_v43 = vpop.f32.mrf.mxu0 }
 0x229   : > { %v1695_v42 = vpop.f32.mrf.mxu3  ;;  %v1359_v45 = vpop.f32.mrf.mxu1 }
 0x22a   : > { %v1696_v44 = vadd.f32 %v1695_v42, %v1526_v41  ;;  %v1360_v56 = vadd.f32 %v1359_v45, %v1190_v43 }
 0x22c   : > { %v2182_v46 = vpack.c.bf16 %v1696_v44, %v1358_v40 }
 0x22e   : > { %2246 = vst [vmem:[%s3580_s12 + $0x140] sm:$0xff] %v2182_v46 }
 0x230   : > { %v1528_v51 = vpop.f32.mrf.mxu2  ;;  %v1193_v54 = vpop.f32.mrf.mxu0 }
 0x231   : > { %v1697_v53 = vpop.f32.mrf.mxu3  ;;  %v1362_v58 = vpop.f32.mrf.mxu1 }
 0x232   : > { %v1698_v57 = vadd.f32 %v1697_v53, %v1528_v51  ;;  %v1363_v60 = vadd.f32 %v1362_v58, %v1193_v54 }
 0x233   : > { %1232 = vmatmul.bf16.gmra.mxu0 %v2658_v52 }
 0x234   : > { %v2183_v59 = vpack.c.bf16 %v1698_v57, %v1360_v56  ;;  %1401 = vmatmul.bf16.gmra.mxu1 %v2662_v55 }
 0x235   : > { %1570 = vmatmul.bf16.gmra.mxu2 %v2658_v52 }
 0x236   : > { %2247 = vst [vmem:[%s3580_s12 + $0x148] sm:$0xff] %v2183_v59  ;;  %1739 = vmatmul.bf16.gmra.mxu3 %v2662_v55 }
 0x238   : > { %v1531_v61 = vpop.f32.mrf.mxu2  ;;  %v1195_v63 = vpop.f32.mrf.mxu0 }
 0x239   : > { %v1700_v62 = vpop.f32.mrf.mxu3  ;;  %v1364_v1 = vpop.f32.mrf.mxu1 }
 0x23a   : > { %v1701_v0 = vadd.f32 %v1700_v62, %v1531_v61  ;;  %v1365_v12 = vadd.f32 %v1364_v1, %v1195_v63 }
 0x23c   : > { %v2184_v2 = vpack.c.bf16 %v1701_v0, %v1363_v60 }
 0x23e   : > { %2248 = vst [vmem:[%s3580_s12 + $0x150] sm:$0xff] %v2184_v2 }
 0x240   : > { %v1533_v7 = vpop.f32.mrf.mxu2  ;;  %v1198_v10 = vpop.f32.mrf.mxu0 }
 0x241   : > { %v1702_v9 = vpop.f32.mrf.mxu3  ;;  %v1367_v14 = vpop.f32.mrf.mxu1 }
 0x242   : > { %v1703_v13 = vadd.f32 %v1702_v9, %v1533_v7  ;;  %v1368_v16 = vadd.f32 %v1367_v14, %v1198_v10 }
 0x243   : > { %1237 = vmatmul.bf16.gmra.mxu0 %v2666_v8 }
 0x244   : > { %v2185_v15 = vpack.c.bf16 %v1703_v13, %v1365_v12  ;;  %1406 = vmatmul.bf16.gmra.mxu1 %v2670_v11 }
 0x245   : > { %1575 = vmatmul.bf16.gmra.mxu2 %v2666_v8 }
 0x246   : > { %2249 = vst [vmem:[%s3580_s12 + $0x158] sm:$0xff] %v2185_v15  ;;  %1744 = vmatmul.bf16.gmra.mxu3 %v2670_v11 }
 0x248   : > { %v1536_v17 = vpop.f32.mrf.mxu2  ;;  %v1200_v19 = vpop.f32.mrf.mxu0 }
 0x249   : > { %v1705_v18 = vpop.f32.mrf.mxu3  ;;  %v1369_v21 = vpop.f32.mrf.mxu1 }
 0x24a   : > { %v1706_v20 = vadd.f32 %v1705_v18, %v1536_v17  ;;  %v1370_v32 = vadd.f32 %v1369_v21, %v1200_v19 }
 0x24c   : > { %v2186_v22 = vpack.c.bf16 %v1706_v20, %v1368_v16 }
 0x24e   : > { %2250 = vst [vmem:[%s3580_s12 + $0x160] sm:$0xff] %v2186_v22 }
 0x250   : > { %v1538_v27 = vpop.f32.mrf.mxu2  ;;  %v1203_v30 = vpop.f32.mrf.mxu0 }
 0x251   : > { %v1707_v29 = vpop.f32.mrf.mxu3  ;;  %v1372_v34 = vpop.f32.mrf.mxu1 }
 0x252   : > { %v1708_v33 = vadd.f32 %v1707_v29, %v1538_v27  ;;  %v1373_v36 = vadd.f32 %v1372_v34, %v1203_v30 }
 0x253   : > { %1242 = vmatmul.bf16.gmra.mxu0 %v2674_v28 }
 0x254   : > { %v2187_v35 = vpack.c.bf16 %v1708_v33, %v1370_v32  ;;  %1411 = vmatmul.bf16.gmra.mxu1 %v2678_v31 }
 0x255   : > { %1580 = vmatmul.bf16.gmra.mxu2 %v2674_v28 }
 0x256   : > { %2251 = vst [vmem:[%s3580_s12 + $0x168] sm:$0xff] %v2187_v35  ;;  %1749 = vmatmul.bf16.gmra.mxu3 %v2678_v31 }
 0x258   : > { %v1541_v37 = vpop.f32.mrf.mxu2  ;;  %v1205_v39 = vpop.f32.mrf.mxu0 }
 0x259   : > { %v1710_v38 = vpop.f32.mrf.mxu3  ;;  %v1374_v41 = vpop.f32.mrf.mxu1 }
 0x25a   : > { %v1711_v40 = vadd.f32 %v1710_v38, %v1541_v37  ;;  %v1375_v46 = vadd.f32 %v1374_v41, %v1205_v39 }
 0x25c   : > { %v2188_v42 = vpack.c.bf16 %v1711_v40, %v1373_v36 }
 0x25e   : > { %2252 = vst [vmem:[%s3580_s12 + $0x170] sm:$0xff] %v2188_v42 }
 0x260   : > { %v1543_v43 = vpop.f32.mrf.mxu2  ;;  %v1208_v45 = vpop.f32.mrf.mxu0 }
 0x261   : > { %v1712_v44 = vpop.f32.mrf.mxu3  ;;  %v1377_v48 = vpop.f32.mrf.mxu1 }
 0x262   : > { %v1713_v47 = vadd.f32 %v1712_v44, %v1543_v43  ;;  %v1378_v50 = vadd.f32 %v1377_v48, %v1208_v45 }
 0x264   : > { %v2189_v49 = vpack.c.bf16 %v1713_v47, %v1375_v46 }
 0x266   : > { %2253 = vst [vmem:[%s3580_s12 + $0x178] sm:$0xff] %v2189_v49 }
 0x268   : > { %v1546_v51 = vpop.f32.mrf.mxu2  ;;  %v1210_v53 = vpop.f32.mrf.mxu0 }
 0x269   : > { %v1715_v52 = vpop.f32.mrf.mxu3  ;;  %v1379_v55 = vpop.f32.mrf.mxu1 }
 0x26a   : > { %v1716_v54 = vadd.f32 %v1715_v52, %v1546_v51  ;;  %v1380_v60 = vadd.f32 %v1379_v55, %v1210_v53 }
 0x26c   : > { %v2190_v56 = vpack.c.bf16 %v1716_v54, %v1378_v50 }
 0x26e   : > { %2254 = vst [vmem:[%s3580_s12 + $0x180] sm:$0xff] %v2190_v56 }
 0x270   : > { %v1548_v57 = vpop.f32.mrf.mxu2  ;;  %v1213_v59 = vpop.f32.mrf.mxu0 }
 0x271   : > { %v1717_v58 = vpop.f32.mrf.mxu3  ;;  %v1382_v62 = vpop.f32.mrf.mxu1 }
 0x272   : > { %v1718_v61 = vadd.f32 %v1717_v58, %v1548_v57  ;;  %v1383_v0 = vadd.f32 %v1382_v62, %v1213_v59 }
 0x274   : > { %v2191_v63 = vpack.c.bf16 %v1718_v61, %v1380_v60 }
 0x276   : > { %2255 = vst [vmem:[%s3580_s12 + $0x188] sm:$0xff] %v2191_v63 }
 0x278   : > { %v1551_v1 = vpop.f32.mrf.mxu2  ;;  %v1215_v3 = vpop.f32.mrf.mxu0 }
 0x279   : > { %v1720_v2 = vpop.f32.mrf.mxu3  ;;  %v1384_v5 = vpop.f32.mrf.mxu1 }
 0x27a   : > { %v1721_v4 = vadd.f32 %v1720_v2, %v1551_v1  ;;  %v1385_v10 = vadd.f32 %v1384_v5, %v1215_v3 }
 0x27c   : > { %v2192_v6 = vpack.c.bf16 %v1721_v4, %v1383_v0 }
 0x27e   : > { %2256 = vst [vmem:[%s3580_s12 + $0x190] sm:$0xff] %v2192_v6 }
 0x280   : > { %v1553_v7 = vpop.f32.mrf.mxu2  ;;  %v1218_v9 = vpop.f32.mrf.mxu0 }
 0x281   : > { %v1722_v8 = vpop.f32.mrf.mxu3  ;;  %v1387_v12 = vpop.f32.mrf.mxu1 }
 0x282   : > { %v1723_v11 = vadd.f32 %v1722_v8, %v1553_v7  ;;  %v1388_v14 = vadd.f32 %v1387_v12, %v1218_v9 }
 0x284   : > { %v2193_v13 = vpack.c.bf16 %v1723_v11, %v1385_v10 }
 0x286   : > { %2257 = vst [vmem:[%s3580_s12 + $0x198] sm:$0xff] %v2193_v13 }
 0x288   : > { %v1556_v15 = vpop.f32.mrf.mxu2  ;;  %v1220_v17 = vpop.f32.mrf.mxu0 }
 0x289   : > { %v1725_v16 = vpop.f32.mrf.mxu3  ;;  %v1389_v19 = vpop.f32.mrf.mxu1 }
 0x28a   : > { %v1726_v18 = vadd.f32 %v1725_v16, %v1556_v15  ;;  %v1390_v24 = vadd.f32 %v1389_v19, %v1220_v17 }
 0x28c   : > { %v2194_v20 = vpack.c.bf16 %v1726_v18, %v1388_v14 }
 0x28e   : > { %2258 = vst [vmem:[%s3580_s12 + $0x1a0] sm:$0xff] %v2194_v20 }
 0x290   : > { %v1558_v21 = vpop.f32.mrf.mxu2  ;;  %v1223_v23 = vpop.f32.mrf.mxu0 }
 0x291   : > { %v1727_v22 = vpop.f32.mrf.mxu3  ;;  %v1392_v26 = vpop.f32.mrf.mxu1 }
 0x292   : > { %v1728_v25 = vadd.f32 %v1727_v22, %v1558_v21  ;;  %v1393_v28 = vadd.f32 %v1392_v26, %v1223_v23 }
 0x294   : > { %v2195_v27 = vpack.c.bf16 %v1728_v25, %v1390_v24 }
 0x296   : > { %2259 = vst [vmem:[%s3580_s12 + $0x1a8] sm:$0xff] %v2195_v27 }
 0x298   : > { %v1561_v29 = vpop.f32.mrf.mxu2  ;;  %v1225_v31 = vpop.f32.mrf.mxu0 }
 0x299   : > { %v1730_v30 = vpop.f32.mrf.mxu3  ;;  %v1394_v33 = vpop.f32.mrf.mxu1 }
 0x29a   : > { %v1731_v32 = vadd.f32 %v1730_v30, %v1561_v29  ;;  %v1395_v38 = vadd.f32 %v1394_v33, %v1225_v31 }
 0x29c   : > { %v2196_v34 = vpack.c.bf16 %v1731_v32, %v1393_v28 }
 0x29e   : > { %2260 = vst [vmem:[%s3580_s12 + $0x1b0] sm:$0xff] %v2196_v34 }
 0x2a0   : > { %v1563_v35 = vpop.f32.mrf.mxu2  ;;  %v1228_v37 = vpop.f32.mrf.mxu0 }
 0x2a1   : > { %v1732_v36 = vpop.f32.mrf.mxu3  ;;  %v1397_v40 = vpop.f32.mrf.mxu1 }
 0x2a2   : > { %v1733_v39 = vadd.f32 %v1732_v36, %v1563_v35  ;;  %v1398_v42 = vadd.f32 %v1397_v40, %v1228_v37 }
 0x2a4   : > { %v2197_v41 = vpack.c.bf16 %v1733_v39, %v1395_v38 }
 0x2a6   : > { %2261 = vst [vmem:[%s3580_s12 + $0x1b8] sm:$0xff] %v2197_v41 }
 0x2a8   : > { %v1566_v43 = vpop.f32.mrf.mxu2  ;;  %v1230_v45 = vpop.f32.mrf.mxu0 }
 0x2a9   : > { %v1735_v44 = vpop.f32.mrf.mxu3  ;;  %v1399_v47 = vpop.f32.mrf.mxu1 }
 0x2aa   : > { %v1736_v46 = vadd.f32 %v1735_v44, %v1566_v43  ;;  %v1400_v52 = vadd.f32 %v1399_v47, %v1230_v45 }
 0x2ac   : > { %v2198_v48 = vpack.c.bf16 %v1736_v46, %v1398_v42 }
 0x2ae   : > { %2262 = vst [vmem:[%s3580_s12 + $0x1c0] sm:$0xff] %v2198_v48 }
 0x2b0   : > { %v1568_v49 = vpop.f32.mrf.mxu2  ;;  %v1233_v51 = vpop.f32.mrf.mxu0 }
 0x2b1   : > { %v1737_v50 = vpop.f32.mrf.mxu3  ;;  %v1402_v54 = vpop.f32.mrf.mxu1 }
 0x2b2   : > { %v1738_v53 = vadd.f32 %v1737_v50, %v1568_v49  ;;  %v1403_v56 = vadd.f32 %v1402_v54, %v1233_v51 }
 0x2b4   : > { %v2199_v55 = vpack.c.bf16 %v1738_v53, %v1400_v52 }
 0x2b6   : > { %2263 = vst [vmem:[%s3580_s12 + $0x1c8] sm:$0xff] %v2199_v55 }
 0x2b8   : > { %v1571_v57 = vpop.f32.mrf.mxu2  ;;  %v1235_v59 = vpop.f32.mrf.mxu0 }
 0x2b9   : > { %v1740_v58 = vpop.f32.mrf.mxu3  ;;  %v1404_v61 = vpop.f32.mrf.mxu1 }
 0x2ba   : > { %v1741_v60 = vadd.f32 %v1740_v58, %v1571_v57  ;;  %v1405_v2 = vadd.f32 %v1404_v61, %v1235_v59 }
 0x2bc   : > { %v2200_v62 = vpack.c.bf16 %v1741_v60, %v1403_v56 }
 0x2be   : > { %2264 = vst [vmem:[%s3580_s12 + $0x1d0] sm:$0xff] %v2200_v62 }
 0x2c0   : > { %v1573_v63 = vpop.f32.mrf.mxu2  ;;  %v1238_v1 = vpop.f32.mrf.mxu0 }
 0x2c1   : > { %v1742_v0 = vpop.f32.mrf.mxu3  ;;  %v1407_v4 = vpop.f32.mrf.mxu1 }
 0x2c2   : > { %v1743_v3 = vadd.f32 %v1742_v0, %v1573_v63  ;;  %v1408_v6 = vadd.f32 %v1407_v4, %v1238_v1 }
 0x2c4   : > { %v2201_v5 = vpack.c.bf16 %v1743_v3, %v1405_v2 }
 0x2c6   : > { %2265 = vst [vmem:[%s3580_s12 + $0x1d8] sm:$0xff] %v2201_v5 }
 0x2c8   : > { %v1576_v7 = vpop.f32.mrf.mxu2  ;;  %v1240_v10 = vpop.f32.mrf.mxu0 }
 0x2c9   : > { %v1745_v8 = vpop.f32.mrf.mxu3  ;;  %v1409_v11 = vpop.f32.mrf.mxu1 }
 0x2ca   : > { %v1746_v9 = vadd.f32 %v1745_v8, %v1576_v7  ;;  %v1410_v15 = vadd.f32 %v1409_v11, %v1240_v10 }
 0x2cc   : > { %v2202_v12 = vpack.c.bf16 %v1746_v9, %v1408_v6 }
 0x2ce   : > { %2266 = vst [vmem:[%s3580_s12 + $0x1e0] sm:$0xff] %v2202_v12 }
 0x2d0   : > { %v1578_v13 = vpop.f32.mrf.mxu2  ;;  %v1243_v18 = vpop.f32.mrf.mxu0 }
 0x2d1   : > { %v1747_v14 = vpop.f32.mrf.mxu3  ;;  %v1412_v19 = vpop.f32.mrf.mxu1 }
 0x2d2   : > { %v1748_v16 = vadd.f32 %v1747_v14, %v1578_v13  ;;  %v1413_v20 = vadd.f32 %v1412_v19, %v1243_v18 }
 0x2d4   : > { %v2203_v17 = vpack.c.bf16 %v1748_v16, %v1410_v15 }
 0x2d6   : > { %2267 = vst [vmem:[%s3580_s12 + $0x1e8] sm:$0xff] %v2203_v17 }
 0x2d8   : > { %v1581_v21 = vpop.f32.mrf.mxu2  ;;  %v1245_v25 = vpop.f32.mrf.mxu0 }
 0x2d9   : > { %v1750_v22 = vpop.f32.mrf.mxu3  ;;  %v1414_v26 = vpop.f32.mrf.mxu1 }
 0x2da   : > { %v1751_v23 = vadd.f32 %v1750_v22, %v1581_v21  ;;  %v1415_v29 = vadd.f32 %v1414_v26, %v1245_v25 }
 0x2dc   : > { %v2204_v24 = vpack.c.bf16 %v1751_v23, %v1413_v20 }
 0x2de   : > { %2268 = vst [vmem:[%s3580_s12 + $0x1f0] sm:$0xff] %v2204_v24 }
 0x2e0   : > { %v1583_v27 = vpop.f32.mrf.mxu2 }
 0x2e1   : > { %v1752_v28 = vpop.f32.mrf.mxu3 }
 0x2e2   : > { %v1753_v30 = vadd.f32 %v1752_v28, %v1583_v27 }
 0x2e4   : > { %v2205_v31 = vpack.c.bf16 %v1753_v30, %v1415_v29 }
 0x2e6   : > { %2269 = vst [vmem:[%s3580_s12 + $0x1f8] sm:$0xff] %v2205_v31 }
 0x2e7   : > { %3138 = shalt.err (!%p3135_p10)
}
 0x2e8   : > { %s3266_s28 = smov 128   ;;  %s3267_s12 = smov 384  }
 0x2e9   : > { %s3268_s29 = smov 8  }
 0x2ea   : > { %2918 = dma.vmem_to_hbm [thread:$0]  (%p3430_p1), %s2287_s18, 8192, %s2289_s24, %s2271_s15, %s3266_s28, %s3267_s12, %s3268_s29  }
 0x2eb PF: > { %p2932_p12 = scmp.ge.s32.totalorder %s3261_s22, 2  ;;  %s2303_s26 = sand.u32 1, %s3209_s9  }
 0x2ec   : > { %s2304_s21 = scalar_lea.sflag [#allocation5], %s2303_s26 }
 0x2ed   : > { %p2928_p3 = pnand %p2932_p12, %p3445_p5 }
 0x2ef   : > { %p2929_p13 = pneg %p2928_p3 }
 0x2f1   : > { %3204 = dma.done.wait (%p2929_p13), %s2304_s21, 8192  }
 0x2f2   : > { %3206 = vsyncadd (%p2929_p13), %s2304_s21, 4294959104  ;;  %s21_s22 = sadd.s32 1, %s3261_s22   ;;  %s3840_s19 = sld [smem:[#allocation16_spill]] }
 0x2f3   : > { %p3759_p0 = scmp.ge.s32.totalorder %s21_s22, 8   ;;  %s3841_s27 = sld [smem:[#allocation13_spill]] }
 0x2f4   : > { %s3842_s24 = sld [smem:[#allocation14_spill]]  ;;  %s3844_s9 = smov %s3213_s10 }
 0x2f5   : > { %s3843_s21 = sld [smem:[#allocation15_spill]]  ;;  %s3845_s10 = smov %s3217_s11 }
 0x2f6   : > { %s3846_s11 = smov %s3442_s6  ;;  %s3847_s12 = smov %s3225_s13 }
 0x2f7   : > { %s3848_s13 = smov %s3229_s14  ;;  %s3850_s15 = smov %s3237_s16 }
 0x2f8   : > { %s3849_s14 = smov %s3840_s19  ;;  %s3851_s16 = smov %s3241_s17 }
 0x2f9   : > { %s3852_s17 = smov %s3439_s0  ;;  %s3853_s18 = smov %s3253_s20 }
 0x2fa   : > { %s3854_s19 = smov %s3841_s27  ;;  %s3855_s20 = smov %s3842_s24 }
 0x2fb   :  { %20 = sbr.rel (!%p3759_p0) target bundleno = 15 (0xf), region = 94 }
 0x300   :  { %2310 = vsyncpa [#allocation4], 1 }
 0x301   :  { %2312 = vsyncpa [#allocation4 + $0x1], 1 }
 0x302   :  { %2313 = vsyncpa [#allocation7], 1 }
 0x303   :  { %2315 = vsyncpa [#allocation7 + $0x1], 1 }
 0x304   :  { %2316 = vsyncpa [#allocation5], 1 }
 0x305   :  { %2318 = vsyncpa [#allocation5 + $0x1], 1 }

</bundles_post_ra>
